<compile_context>
chip_gen: v7x
topology: tpu7x:2x2x1
jax: 0.10.0
libtpu: 0.0.40
codegen_flags: <defaults>
</compile_context>

<pallas_src>
import jax
import jax.numpy as jnp
from jax.experimental import pallas as pl
from jax.experimental.pallas import tpu as pltpu

F1, F2, H, A = 64, 32, 16, 3      # feature dims, LSTM hidden, action count
EPS = 1e-5                        # nn.LayerNorm default eps
OUT_W = 128                       # lane-dense packed output width
H_OFF, C_OFF = 32, 64             # lane offsets of h_n / c_n in the packed output


def _layernorm(x, gamma, beta):
    mu = jnp.mean(x, axis=-1, keepdims=True)
    var = jnp.mean((x - mu) ** 2, axis=-1, keepdims=True)
    return (x - mu) * jax.lax.rsqrt(var + EPS) * gamma + beta


def dqn_kernel(x_ref,                                   # (bb, T, D) batch-major block
               w1_ref, b1_ref, g1_ref, be1_ref,         # Linear(D,64)+LN
               w2_ref, b2_ref, g2_ref, be2_ref,         # Linear(64,32)+LN
               wih_ref, whh_ref, blstm_ref,             # LSTM (pre-transposed, bias pre-summed)
               wph_ref, wpc_ref, bpack_ref,             # packed value-head / output epilogue
               out_ref,                                 # (bb, 128) packed q|h|c (lane-aligned)
               gates_ref):                              # VMEM scratch (T, bb, 4H), time-major
    bb, T, D = x_ref.shape
    x2d = x_ref[...].reshape(bb * T, D).astype(jnp.float32)

    # ---- feature_net: Linear -> LN -> ReLU -> Linear -> LN -> ReLU
    h1 = jnp.dot(x2d, w1_ref[...], preferred_element_type=jnp.float32) + b1_ref[...]
    h1 = jnp.maximum(_layernorm(h1, g1_ref[...], be1_ref[...]), 0.0)
    h2 = jnp.dot(h1, w2_ref[...], preferred_element_type=jnp.float32) + b2_ref[...]
    h2 = jnp.maximum(_layernorm(h2, g2_ref[...], be2_ref[...]), 0.0)

    # ---- LSTM input projection hoisted out of the recurrence (single matmul).
    # PyTorch gate order i, f, g, o.  Reorder to time-major in VMEM scratch so
    # the per-step slice inside the serial recurrence is a free leading-axis
    # load, and the big (bb, T, 4H) tensor does not stay live in vregs.
    gates3 = (jnp.dot(h2, wih_ref[...], preferred_element_type=jnp.float32)
              + blstm_ref[...]).reshape(bb, T, 4 * H)
    for t in range(T):                                  # static: T is small (8)
        gates_ref[t] = gates3[:, t, :]

    whh = whh_ref[...]                                  # (H, 4H), already transposed

    # ---- t = 0: h == c == 0, so skip the recurrent matmul entirely.
    g0 = gates_ref[0]
    sig0 = jax.nn.sigmoid(g0)                           # one EUP push for i, f, o
    c = sig0[:, 0:H] * jnp.tanh(g0[:, 2 * H:3 * H])     # f * c_prev == 0
    h = sig0[:, 3 * H:4 * H] * jnp.tanh(c)

    # ---- t = 1 .. T-1 (static unroll; per-step gates loaded from VMEM scratch).
    for t in range(1, T):
        gates = gates_ref[t] + jnp.dot(h, whh, preferred_element_type=jnp.float32)
        sig = jax.nn.sigmoid(gates)                     # one EUP push for i, f, o
        g = jnp.tanh(gates[:, 2 * H:3 * H])
        i = sig[:, 0:H]
        f = sig[:, H:2 * H]
        o = sig[:, 3 * H:4 * H]
        c = f * c + i * g
        h = o * jnp.tanh(c)

    # ---- packed epilogue: one lane-aligned (bb, 128) store.
    #   lanes [0, A)         : q = h @ wv + bv
    #   lanes [32, 32+H)     : h_n   (identity block inside wph)
    #   lanes [64, 64+H)     : c_n   (identity block inside wpc)
    out_ref[...] = (jnp.dot(h, wph_ref[...], preferred_element_type=jnp.float32)
                    + jnp.dot(c, wpc_ref[...], preferred_element_type=jnp.float32)
                    + bpack_ref[...]).astype(out_ref.dtype)


def dqn_forward(x, params):
    B, T, D = x.shape

    # ---- batch-block selection (perf review):
    #   * v5e/v6e have a single TensorCore: grid=(1,) (bb=B) removes all
    #     per-grid-step pipeline overhead.
    #   * v7x has 2 TCs: split 2-way for B >= 16 so dimension_semantics
    #     "parallel" shards the grid across both cores (costs one extra grid
    #     step, ~0.35 us, on single-TC chips -- negligible).
    #   * keep per-block rows bounded so VMEM never binds (per-row footprint
    #     is only ~10 KB; v7x physical VMEM is 64 MiB).
    MAX_BB = 4096
    if B >= 16 and B % 16 == 0:
        n_blocks = 2
        while B // n_blocks > MAX_BB and (B // (2 * n_blocks)) % 8 == 0:
            n_blocks *= 2
    else:
        n_blocks = 1
    bb = B // n_blocks
    grid = (n_blocks,)

    # Raise the scoped-VMEM limit only when the per-block footprint would
    # exceed the 16 MiB default (v5e).  Rough per-row cost: x block (double
    # buffered) + packed output + gates scratch + in-flight temporaries.
    est_bytes = bb * 10_500 + (1 << 20)
    vmem_limit = None
    if est_bytes > 16 * 1024 * 1024:
        vmem_limit = min(int(est_bytes * 1.5), 56 * 1024 * 1024)

    b_lstm = params["bih"] + params["bhh"]              # combined LSTM bias (1, 4H)

    # Packed value-head / epilogue weights (lane-aligned q | h | c layout).
    eye = jnp.eye(H, dtype=jnp.float32)
    wph = jnp.zeros((H, OUT_W), jnp.float32)
    wph = wph.at[:, 0:A].set(params["wv"])
    wph = wph.at[:, H_OFF:H_OFF + H].set(eye)
    wpc = jnp.zeros((H, OUT_W), jnp.float32).at[:, C_OFF:C_OFF + H].set(eye)
    bpack = jnp.zeros((1, OUT_W), jnp.float32).at[:, 0:A].set(params["bv"])

    args = (x,
            params["w1"], params["b1"], params["g1"], params["be1"],
            params["w2"], params["b2"], params["g2"], params["be2"],
            params["wih"], params["whh"], b_lstm,
            wph, wpc, bpack)

    vmem = lambda: pl.BlockSpec(memory_space=pltpu.MemorySpace.VMEM)
    in_specs = [pl.BlockSpec((bb, T, D), lambda i: (i, 0, 0))]
    in_specs += [vmem() for _ in range(len(args) - 1)]

    out = pl.pallas_call(
        dqn_kernel,
        out_shape=jax.ShapeDtypeStruct((B, OUT_W), jnp.float32),
        grid=grid,
        in_specs=in_specs,
        out_specs=pl.BlockSpec((bb, OUT_W), lambda i: (i, 0)),
        scratch_shapes=[pltpu.VMEM((T, bb, 4 * H), jnp.float32)],
        compiler_params=pltpu.CompilerParams(
            dimension_semantics=("parallel",),
            vmem_limit_bytes=vmem_limit),
    )(*args)

    q = out[:, 0:A]
    hn = out[:, H_OFF:H_OFF + H]
    cn = out[:, C_OFF:C_OFF + H]
    # PyTorch returns (h_n, c_n) with shape (num_layers, B, H) = (1, B, H)
    return q, (hn[None], cn[None])


def init_params(key, input_size):
    """Weights stored pre-transposed: (in_features, out_features)."""
    ks = jax.random.split(key, 8)
    ortho = jax.nn.initializers.orthogonal(scale=0.5)   # gain=0.5 orthogonal_
    k = 1.0 / jnp.sqrt(jnp.float32(H))                  # PyTorch LSTM default init
    uni = lambda kk, shape: jax.random.uniform(kk, shape, jnp.float32, -k, k)
    return dict(
        w1=ortho(ks[0], (F1, input_size), jnp.float32).T,   # (D, 64)
        b1=jnp.zeros((1, F1), jnp.float32),
        g1=jnp.ones((1, F1), jnp.float32),
        be1=jnp.zeros((1, F1), jnp.float32),
        w2=ortho(ks[1], (F2, F1), jnp.float32).T,            # (64, 32)
        b2=jnp.zeros((1, F2), jnp.float32),
        g2=jnp.ones((1, F2), jnp.float32),
        be2=jnp.zeros((1, F2), jnp.float32),
        wih=uni(ks[2], (4 * H, F2)).T,                       # (32, 64)
        whh=uni(ks[3], (4 * H, H)).T,                        # (16, 64)
        bih=uni(ks[4], (1, 4 * H)),
        bhh=uni(ks[5], (1, 4 * H)),
        wv=ortho(ks[6], (A, H), jnp.float32).T,              # (16, 3)
        bv=jnp.zeros((1, A), jnp.float32),
    )


def dqn_reference(x, params):
    """Pure-JAX reference for correctness checking."""
    B, T, D = x.shape
    x2d = x.reshape(B * T, D)
    h1 = jnp.maximum(
        _layernorm(x2d @ params["w1"] + params["b1"], params["g1"], params["be1"]), 0.0)
    h2 = jnp.maximum(
        _layernorm(h1 @ params["w2"] + params["b2"], params["g2"], params["be2"]), 0.0)
    feats = h2.reshape(B, T, F2)
    bias = params["bih"] + params["bhh"]
    h = jnp.zeros((B, H), jnp.float32)
    c = jnp.zeros((B, H), jnp.float32)
    for t in range(T):
        gates = feats[:, t, :] @ params["wih"] + h @ params["whh"] + bias
        i = jax.nn.sigmoid(gates[:, 0:H])
        f = jax.nn.sigmoid(gates[:, H:2 * H])
        g = jnp.tanh(gates[:, 2 * H:3 * H])
        o = jax.nn.sigmoid(gates[:, 3 * H:4 * H])
        c = f * c + i * g
        h = o * jnp.tanh(c)
    q = h @ params["wv"] + params["bv"]
    return q, (h[None], c[None])


if __name__ == "__main__":
    key = jax.random.PRNGKey(0)
    kx, kp = jax.random.split(key)
    B, T, D = 2, 8, 32
    x = jax.random.normal(kx, (B, T, D), jnp.float32)
    params = init_params(kp, D)

    q, (hn, cn) = dqn_forward(x, params)
    jax.block_until_ready((q, hn, cn))

    assert q.shape == (B, A) and hn.shape == (1, B, H) and cn.shape == (1, B, H)

    q_ref, (hn_ref, cn_ref) = dqn_reference(x, params)
    assert jnp.allclose(q, q_ref, rtol=2e-3, atol=2e-3)
    assert jnp.allclose(hn, hn_ref, rtol=2e-3, atol=2e-3)
    assert jnp.allclose(cn, cn_ref, rtol=2e-3, atol=2e-3)

    print("KERNEL_OK")
</pallas_src>

<mosaic_0001>
module attributes {stable_mosaic.version = 11 : i64} {
  func.func @dqn_kernel(%arg0: i32, %arg1: memref<2x8x32xf32, #tpu.memory_space<vmem>>, %arg2: memref<32x64xf32, #tpu.memory_space<vmem>>, %arg3: memref<1x64xf32, #tpu.memory_space<vmem>>, %arg4: memref<1x64xf32, #tpu.memory_space<vmem>>, %arg5: memref<1x64xf32, #tpu.memory_space<vmem>>, %arg6: memref<64x32xf32, #tpu.memory_space<vmem>>, %arg7: memref<1x32xf32, #tpu.memory_space<vmem>>, %arg8: memref<1x32xf32, #tpu.memory_space<vmem>>, %arg9: memref<1x32xf32, #tpu.memory_space<vmem>>, %arg10: memref<32x64xf32, #tpu.memory_space<vmem>>, %arg11: memref<16x64xf32, #tpu.memory_space<vmem>>, %arg12: memref<1x64xf32, #tpu.memory_space<vmem>>, %arg13: memref<16x128xf32, #tpu.memory_space<vmem>>, %arg14: memref<16x128xf32, #tpu.memory_space<vmem>>, %arg15: memref<1x128xf32, #tpu.memory_space<vmem>>, %arg16: memref<2x128xf32, #tpu.memory_space<vmem>>, %arg17: memref<8x2x64xf32, #tpu.memory_space<vmem>>) attributes {dimension_semantics = [#tpu.dimension_semantics<parallel>], iteration_bounds = array<i64: 1>, scalar_prefetch = 0 : i64, scratch_operands = 1 : i64, tpu.core_type = #tpu.core_type<tc>, window_params = [{transform_indices = @transform_0, window_bounds = array<i64: 2, 8, 32>}, {pipeline_mode = #tpu.pipeline_mode<synchronous>, transform_indices = @transform_1, window_bounds = array<i64: 32, 64>}, {pipeline_mode = #tpu.pipeline_mode<synchronous>, transform_indices = @transform_2, window_bounds = array<i64: 1, 64>}, {pipeline_mode = #tpu.pipeline_mode<synchronous>, transform_indices = @transform_3, window_bounds = array<i64: 1, 64>}, {pipeline_mode = #tpu.pipeline_mode<synchronous>, transform_indices = @transform_4, window_bounds = array<i64: 1, 64>}, {pipeline_mode = #tpu.pipeline_mode<synchronous>, transform_indices = @transform_5, window_bounds = array<i64: 64, 32>}, {pipeline_mode = #tpu.pipeline_mode<synchronous>, transform_indices = @transform_6, window_bounds = array<i64: 1, 32>}, {pipeline_mode = #tpu.pipeline_mode<synchronous>, transform_indices = @transform_7, window_bounds = array<i64: 1, 32>}, {pipeline_mode = #tpu.pipeline_mode<synchronous>, transform_indices = @transform_8, window_bounds = array<i64: 1, 32>}, {pipeline_mode = #tpu.pipeline_mode<synchronous>, transform_indices = @transform_9, window_bounds = array<i64: 32, 64>}, {pipeline_mode = #tpu.pipeline_mode<synchronous>, transform_indices = @transform_10, window_bounds = array<i64: 16, 64>}, {pipeline_mode = #tpu.pipeline_mode<synchronous>, transform_indices = @transform_11, window_bounds = array<i64: 1, 64>}, {pipeline_mode = #tpu.pipeline_mode<synchronous>, transform_indices = @transform_12, window_bounds = array<i64: 16, 128>}, {pipeline_mode = #tpu.pipeline_mode<synchronous>, transform_indices = @transform_13, window_bounds = array<i64: 16, 128>}, {pipeline_mode = #tpu.pipeline_mode<synchronous>, transform_indices = @transform_14, window_bounds = array<i64: 1, 128>}, {transform_indices = @transform_15, window_bounds = array<i64: 2, 128>}]} {
    %c0 = arith.constant 0 : index
    %c0_0 = arith.constant 0 : index
    %c0_1 = arith.constant 0 : index
    %0 = vector.load %arg1[%c0, %c0_0, %c0_1] : memref<2x8x32xf32, #tpu.memory_space<vmem>>, vector<2x8x32xf32>
    %1 = vector.shape_cast %0 : vector<2x8x32xf32> to vector<16x32xf32>
    %c0_2 = arith.constant 0 : index
    %c0_3 = arith.constant 0 : index
    %2 = vector.load %arg2[%c0_2, %c0_3] : memref<32x64xf32, #tpu.memory_space<vmem>>, vector<32x64xf32>
    %cst = arith.constant dense<0.000000e+00> : vector<16x64xf32>
    %3 = tpu.matmul %1, %2, %cst {dimension_numbers = #tpu.dot_dimension_numbers<[1], [0], [0], [1], [0, 0, 1, 1], [], []>} : vector<16x32xf32>, vector<32x64xf32>, vector<16x64xf32> -> vector<16x64xf32>
    %c0_4 = arith.constant 0 : index
    %c0_5 = arith.constant 0 : index
    %4 = vector.load %arg3[%c0_4, %c0_5] : memref<1x64xf32, #tpu.memory_space<vmem>>, vector<1x64xf32>
    %5 = vector.broadcast %4 : vector<1x64xf32> to vector<16x64xf32>
    %6 = arith.addf %3, %5 : vector<16x64xf32>
    %c0_6 = arith.constant 0 : index
    %c0_7 = arith.constant 0 : index
    %7 = vector.load %arg4[%c0_6, %c0_7] : memref<1x64xf32, #tpu.memory_space<vmem>>, vector<1x64xf32>
    %c0_8 = arith.constant 0 : index
    %c0_9 = arith.constant 0 : index
    %8 = vector.load %arg5[%c0_8, %c0_9] : memref<1x64xf32, #tpu.memory_space<vmem>>, vector<1x64xf32>
    %cst_10 = arith.constant dense<0.000000e+00> : vector<16xf32>
    %9 = vector.multi_reduction <add>, %6, %cst_10 [1] : vector<16x64xf32> to vector<16xf32>
    %10 = vector.shape_cast %9 : vector<16xf32> to vector<16x1xf32>
    %cst_11 = arith.constant 6.400000e+01 : f32
    %11 = vector.broadcast %cst_11 : f32 to vector<16x1xf32>
    %12 = arith.divf %10, %11 : vector<16x1xf32>
    %13 = vector.broadcast %12 : vector<16x1xf32> to vector<16x64xf32>
    %14 = arith.subf %6, %13 : vector<16x64xf32>
    %15 = arith.mulf %14, %14 : vector<16x64xf32>
    %cst_12 = arith.constant dense<0.000000e+00> : vector<16xf32>
    %16 = vector.multi_reduction <add>, %15, %cst_12 [1] : vector<16x64xf32> to vector<16xf32>
    %17 = vector.shape_cast %16 : vector<16xf32> to vector<16x1xf32>
    %cst_13 = arith.constant 6.400000e+01 : f32
    %18 = vector.broadcast %cst_13 : f32 to vector<16x1xf32>
    %19 = arith.divf %17, %18 : vector<16x1xf32>
    %20 = vector.broadcast %12 : vector<16x1xf32> to vector<16x64xf32>
    %21 = arith.subf %6, %20 : vector<16x64xf32>
    %cst_14 = arith.constant 9.99999974E-6 : f32
    %22 = vector.broadcast %cst_14 : f32 to vector<16x1xf32>
    %23 = arith.addf %19, %22 : vector<16x1xf32>
    %24 = math.rsqrt %23 : vector<16x1xf32>
    %25 = vector.broadcast %24 : vector<16x1xf32> to vector<16x64xf32>
    %26 = arith.mulf %21, %25 : vector<16x64xf32>
    %27 = vector.broadcast %7 : vector<1x64xf32> to vector<16x64xf32>
    %28 = arith.mulf %26, %27 : vector<16x64xf32>
    %29 = vector.broadcast %8 : vector<1x64xf32> to vector<16x64xf32>
    %30 = arith.addf %28, %29 : vector<16x64xf32>
    %cst_15 = arith.constant 0.000000e+00 : f32
    %31 = vector.broadcast %cst_15 : f32 to vector<16x64xf32>
    %32 = arith.maximumf %30, %31 : vector<16x64xf32>
    %c0_16 = arith.constant 0 : index
    %c0_17 = arith.constant 0 : index
    %33 = vector.load %arg6[%c0_16, %c0_17] : memref<64x32xf32, #tpu.memory_space<vmem>>, vector<64x32xf32>
    %cst_18 = arith.constant dense<0.000000e+00> : vector<16x32xf32>
    %34 = tpu.matmul %32, %33, %cst_18 {dimension_numbers = #tpu.dot_dimension_numbers<[1], [0], [0], [1], [0, 0, 1, 1], [], []>} : vector<16x64xf32>, vector<64x32xf32>, vector<16x32xf32> -> vector<16x32xf32>
    %c0_19 = arith.constant 0 : index
    %c0_20 = arith.constant 0 : index
    %35 = vector.load %arg7[%c0_19, %c0_20] : memref<1x32xf32, #tpu.memory_space<vmem>>, vector<1x32xf32>
    %36 = vector.broadcast %35 : vector<1x32xf32> to vector<16x32xf32>
    %37 = arith.addf %34, %36 : vector<16x32xf32>
    %c0_21 = arith.constant 0 : index
    %c0_22 = arith.constant 0 : index
    %38 = vector.load %arg8[%c0_21, %c0_22] : memref<1x32xf32, #tpu.memory_space<vmem>>, vector<1x32xf32>
    %c0_23 = arith.constant 0 : index
    %c0_24 = arith.constant 0 : index
    %39 = vector.load %arg9[%c0_23, %c0_24] : memref<1x32xf32, #tpu.memory_space<vmem>>, vector<1x32xf32>
    %cst_25 = arith.constant dense<0.000000e+00> : vector<16xf32>
    %40 = vector.multi_reduction <add>, %37, %cst_25 [1] : vector<16x32xf32> to vector<16xf32>
    %41 = vector.shape_cast %40 : vector<16xf32> to vector<16x1xf32>
    %cst_26 = arith.constant 3.200000e+01 : f32
    %42 = vector.broadcast %cst_26 : f32 to vector<16x1xf32>
    %43 = arith.divf %41, %42 : vector<16x1xf32>
    %44 = vector.broadcast %43 : vector<16x1xf32> to vector<16x32xf32>
    %45 = arith.subf %37, %44 : vector<16x32xf32>
    %46 = arith.mulf %45, %45 : vector<16x32xf32>
    %cst_27 = arith.constant dense<0.000000e+00> : vector<16xf32>
    %47 = vector.multi_reduction <add>, %46, %cst_27 [1] : vector<16x32xf32> to vector<16xf32>
    %48 = vector.shape_cast %47 : vector<16xf32> to vector<16x1xf32>
    %cst_28 = arith.constant 3.200000e+01 : f32
    %49 = vector.broadcast %cst_28 : f32 to vector<16x1xf32>
    %50 = arith.divf %48, %49 : vector<16x1xf32>
    %51 = vector.broadcast %43 : vector<16x1xf32> to vector<16x32xf32>
    %52 = arith.subf %37, %51 : vector<16x32xf32>
    %cst_29 = arith.constant 9.99999974E-6 : f32
    %53 = vector.broadcast %cst_29 : f32 to vector<16x1xf32>
    %54 = arith.addf %50, %53 : vector<16x1xf32>
    %55 = math.rsqrt %54 : vector<16x1xf32>
    %56 = vector.broadcast %55 : vector<16x1xf32> to vector<16x32xf32>
    %57 = arith.mulf %52, %56 : vector<16x32xf32>
    %58 = vector.broadcast %38 : vector<1x32xf32> to vector<16x32xf32>
    %59 = arith.mulf %57, %58 : vector<16x32xf32>
    %60 = vector.broadcast %39 : vector<1x32xf32> to vector<16x32xf32>
    %61 = arith.addf %59, %60 : vector<16x32xf32>
    %cst_30 = arith.constant 0.000000e+00 : f32
    %62 = vector.broadcast %cst_30 : f32 to vector<16x32xf32>
    %63 = arith.maximumf %61, %62 : vector<16x32xf32>
    %c0_31 = arith.constant 0 : index
    %c0_32 = arith.constant 0 : index
    %64 = vector.load %arg10[%c0_31, %c0_32] : memref<32x64xf32, #tpu.memory_space<vmem>>, vector<32x64xf32>
    %cst_33 = arith.constant dense<0.000000e+00> : vector<16x64xf32>
    %65 = tpu.matmul %63, %64, %cst_33 {dimension_numbers = #tpu.dot_dimension_numbers<[1], [0], [0], [1], [0, 0, 1, 1], [], []>} : vector<16x32xf32>, vector<32x64xf32>, vector<16x64xf32> -> vector<16x64xf32>
    %c0_34 = arith.constant 0 : index
    %c0_35 = arith.constant 0 : index
    %66 = vector.load %arg12[%c0_34, %c0_35] : memref<1x64xf32, #tpu.memory_space<vmem>>, vector<1x64xf32>
    %67 = vector.broadcast %66 : vector<1x64xf32> to vector<16x64xf32>
    %68 = arith.addf %65, %67 : vector<16x64xf32>
    %69 = vector.shape_cast %68 : vector<16x64xf32> to vector<2x8x64xf32>
    %70 = vector.extract_strided_slice %69 {offsets = [0, 0, 0], sizes = [2, 1, 64], strides = [1, 1, 1]} : vector<2x8x64xf32> to vector<2x1x64xf32>
    %71 = vector.shape_cast %70 : vector<2x1x64xf32> to vector<2x64xf32>
    %c0_36 = arith.constant 0 : index
    %c0_37 = arith.constant 0 : index
    %c0_38 = arith.constant 0 : index
    %72 = vector.load %arg17[%c0_36, %c0_37, %c0_38] : memref<8x2x64xf32, #tpu.memory_space<vmem>>, vector<1x2x64xf32>
    %73 = vector.shape_cast %72 : vector<1x2x64xf32> to vector<2x64xf32>
    %74 = vector.shape_cast %71 : vector<2x64xf32> to vector<1x2x64xf32>
    tpu.vector_store %arg17[%c0_36, %c0_37, %c0_38], %74 {strides = array<i32>} : memref<8x2x64xf32, #tpu.memory_space<vmem>>, vector<1x2x64xf32>,
    %75 = vector.extract_strided_slice %69 {offsets = [0, 1, 0], sizes = [2, 1, 64], strides = [1, 1, 1]} : vector<2x8x64xf32> to vector<2x1x64xf32>
    %76 = vector.shape_cast %75 : vector<2x1x64xf32> to vector<2x64xf32>
    %c1 = arith.constant 1 : index
    %c0_39 = arith.constant 0 : index
    %c0_40 = arith.constant 0 : index
    %77 = vector.load %arg17[%c1, %c0_39, %c0_40] : memref<8x2x64xf32, #tpu.memory_space<vmem>>, vector<1x2x64xf32>
    %78 = vector.shape_cast %77 : vector<1x2x64xf32> to vector<2x64xf32>
    %79 = vector.shape_cast %76 : vector<2x64xf32> to vector<1x2x64xf32>
    tpu.vector_store %arg17[%c1, %c0_39, %c0_40], %79 {strides = array<i32>} : memref<8x2x64xf32, #tpu.memory_space<vmem>>, vector<1x2x64xf32>,
    %80 = vector.extract_strided_slice %69 {offsets = [0, 2, 0], sizes = [2, 1, 64], strides = [1, 1, 1]} : vector<2x8x64xf32> to vector<2x1x64xf32>
    %81 = vector.shape_cast %80 : vector<2x1x64xf32> to vector<2x64xf32>
    %c2 = arith.constant 2 : index
    %c0_41 = arith.constant 0 : index
    %c0_42 = arith.constant 0 : index
    %82 = vector.load %arg17[%c2, %c0_41, %c0_42] : memref<8x2x64xf32, #tpu.memory_space<vmem>>, vector<1x2x64xf32>
    %83 = vector.shape_cast %82 : vector<1x2x64xf32> to vector<2x64xf32>
    %84 = vector.shape_cast %81 : vector<2x64xf32> to vector<1x2x64xf32>
    tpu.vector_store %arg17[%c2, %c0_41, %c0_42], %84 {strides = array<i32>} : memref<8x2x64xf32, #tpu.memory_space<vmem>>, vector<1x2x64xf32>,
    %85 = vector.extract_strided_slice %69 {offsets = [0, 3, 0], sizes = [2, 1, 64], strides = [1, 1, 1]} : vector<2x8x64xf32> to vector<2x1x64xf32>
    %86 = vector.shape_cast %85 : vector<2x1x64xf32> to vector<2x64xf32>
    %c3 = arith.constant 3 : index
    %c0_43 = arith.constant 0 : index
    %c0_44 = arith.constant 0 : index
    %87 = vector.load %arg17[%c3, %c0_43, %c0_44] : memref<8x2x64xf32, #tpu.memory_space<vmem>>, vector<1x2x64xf32>
    %88 = vector.shape_cast %87 : vector<1x2x64xf32> to vector<2x64xf32>
    %89 = vector.shape_cast %86 : vector<2x64xf32> to vector<1x2x64xf32>
    tpu.vector_store %arg17[%c3, %c0_43, %c0_44], %89 {strides = array<i32>} : memref<8x2x64xf32, #tpu.memory_space<vmem>>, vector<1x2x64xf32>,
    %90 = vector.extract_strided_slice %69 {offsets = [0, 4, 0], sizes = [2, 1, 64], strides = [1, 1, 1]} : vector<2x8x64xf32> to vector<2x1x64xf32>
    %91 = vector.shape_cast %90 : vector<2x1x64xf32> to vector<2x64xf32>
    %c4 = arith.constant 4 : index
    %c0_45 = arith.constant 0 : index
    %c0_46 = arith.constant 0 : index
    %92 = vector.load %arg17[%c4, %c0_45, %c0_46] : memref<8x2x64xf32, #tpu.memory_space<vmem>>, vector<1x2x64xf32>
    %93 = vector.shape_cast %92 : vector<1x2x64xf32> to vector<2x64xf32>
    %94 = vector.shape_cast %91 : vector<2x64xf32> to vector<1x2x64xf32>
    tpu.vector_store %arg17[%c4, %c0_45, %c0_46], %94 {strides = array<i32>} : memref<8x2x64xf32, #tpu.memory_space<vmem>>, vector<1x2x64xf32>,
    %95 = vector.extract_strided_slice %69 {offsets = [0, 5, 0], sizes = [2, 1, 64], strides = [1, 1, 1]} : vector<2x8x64xf32> to vector<2x1x64xf32>
    %96 = vector.shape_cast %95 : vector<2x1x64xf32> to vector<2x64xf32>
    %c5 = arith.constant 5 : index
    %c0_47 = arith.constant 0 : index
    %c0_48 = arith.constant 0 : index
    %97 = vector.load %arg17[%c5, %c0_47, %c0_48] : memref<8x2x64xf32, #tpu.memory_space<vmem>>, vector<1x2x64xf32>
    %98 = vector.shape_cast %97 : vector<1x2x64xf32> to vector<2x64xf32>
    %99 = vector.shape_cast %96 : vector<2x64xf32> to vector<1x2x64xf32>
    tpu.vector_store %arg17[%c5, %c0_47, %c0_48], %99 {strides = array<i32>} : memref<8x2x64xf32, #tpu.memory_space<vmem>>, vector<1x2x64xf32>,
    %100 = vector.extract_strided_slice %69 {offsets = [0, 6, 0], sizes = [2, 1, 64], strides = [1, 1, 1]} : vector<2x8x64xf32> to vector<2x1x64xf32>
    %101 = vector.shape_cast %100 : vector<2x1x64xf32> to vector<2x64xf32>
    %c6 = arith.constant 6 : index
    %c0_49 = arith.constant 0 : index
    %c0_50 = arith.constant 0 : index
    %102 = vector.load %arg17[%c6, %c0_49, %c0_50] : memref<8x2x64xf32, #tpu.memory_space<vmem>>, vector<1x2x64xf32>
    %103 = vector.shape_cast %102 : vector<1x2x64xf32> to vector<2x64xf32>
    %104 = vector.shape_cast %101 : vector<2x64xf32> to vector<1x2x64xf32>
    tpu.vector_store %arg17[%c6, %c0_49, %c0_50], %104 {strides = array<i32>} : memref<8x2x64xf32, #tpu.memory_space<vmem>>, vector<1x2x64xf32>,
    %105 = vector.extract_strided_slice %69 {offsets = [0, 7, 0], sizes = [2, 1, 64], strides = [1, 1, 1]} : vector<2x8x64xf32> to vector<2x1x64xf32>
    %106 = vector.shape_cast %105 : vector<2x1x64xf32> to vector<2x64xf32>
    %c7 = arith.constant 7 : index
    %c0_51 = arith.constant 0 : index
    %c0_52 = arith.constant 0 : index
    %107 = vector.load %arg17[%c7, %c0_51, %c0_52] : memref<8x2x64xf32, #tpu.memory_space<vmem>>, vector<1x2x64xf32>
    %108 = vector.shape_cast %107 : vector<1x2x64xf32> to vector<2x64xf32>
    %109 = vector.shape_cast %106 : vector<2x64xf32> to vector<1x2x64xf32>
    tpu.vector_store %arg17[%c7, %c0_51, %c0_52], %109 {strides = array<i32>} : memref<8x2x64xf32, #tpu.memory_space<vmem>>, vector<1x2x64xf32>,
    %c0_53 = arith.constant 0 : index
    %c0_54 = arith.constant 0 : index
    %110 = vector.load %arg11[%c0_53, %c0_54] : memref<16x64xf32, #tpu.memory_space<vmem>>, vector<16x64xf32>
    %c0_55 = arith.constant 0 : index
    %c0_56 = arith.constant 0 : index
    %c0_57 = arith.constant 0 : index
    %111 = vector.load %arg17[%c0_55, %c0_56, %c0_57] : memref<8x2x64xf32, #tpu.memory_space<vmem>>, vector<1x2x64xf32>
    %112 = vector.shape_cast %111 : vector<1x2x64xf32> to vector<2x64xf32>
    %113 = arith.negf %112 : vector<2x64xf32>
    %114 = math.exp %113 : vector<2x64xf32>
    %cst_58 = arith.constant 1.000000e+00 : f32
    %115 = vector.broadcast %cst_58 : f32 to vector<2x64xf32>
    %116 = arith.addf %115, %114 : vector<2x64xf32>
    %117 = arith.divf %115, %116 : vector<2x64xf32>
    %118 = vector.extract_strided_slice %117 {offsets = [0, 0], sizes = [2, 16], strides = [1, 1]} : vector<2x64xf32> to vector<2x16xf32>
    %119 = vector.extract_strided_slice %112 {offsets = [0, 32], sizes = [2, 16], strides = [1, 1]} : vector<2x64xf32> to vector<2x16xf32>
    %120 = math.tanh %119 : vector<2x16xf32>
    %121 = arith.mulf %118, %120 : vector<2x16xf32>
    %122 = vector.extract_strided_slice %117 {offsets = [0, 48], sizes = [2, 16], strides = [1, 1]} : vector<2x64xf32> to vector<2x16xf32>
    %123 = math.tanh %121 : vector<2x16xf32>
    %124 = arith.mulf %122, %123 : vector<2x16xf32>
    %c1_59 = arith.constant 1 : index
    %c0_60 = arith.constant 0 : index
    %c0_61 = arith.constant 0 : index
    %125 = vector.load %arg17[%c1_59, %c0_60, %c0_61] : memref<8x2x64xf32, #tpu.memory_space<vmem>>, vector<1x2x64xf32>
    %126 = vector.shape_cast %125 : vector<1x2x64xf32> to vector<2x64xf32>
    %cst_62 = arith.constant dense<0.000000e+00> : vector<2x64xf32>
    %127 = tpu.matmul %124, %110, %cst_62 {dimension_numbers = #tpu.dot_dimension_numbers<[1], [0], [0], [1], [0, 0, 1, 1], [], []>} : vector<2x16xf32>, vector<16x64xf32>, vector<2x64xf32> -> vector<2x64xf32>
    %128 = arith.addf %126, %127 : vector<2x64xf32>
    %129 = arith.negf %128 : vector<2x64xf32>
    %130 = math.exp %129 : vector<2x64xf32>
    %cst_63 = arith.constant 1.000000e+00 : f32
    %131 = vector.broadcast %cst_63 : f32 to vector<2x64xf32>
    %132 = arith.addf %131, %130 : vector<2x64xf32>
    %133 = arith.divf %131, %132 : vector<2x64xf32>
    %134 = vector.extract_strided_slice %128 {offsets = [0, 32], sizes = [2, 16], strides = [1, 1]} : vector<2x64xf32> to vector<2x16xf32>
    %135 = math.tanh %134 : vector<2x16xf32>
    %136 = vector.extract_strided_slice %133 {offsets = [0, 0], sizes = [2, 16], strides = [1, 1]} : vector<2x64xf32> to vector<2x16xf32>
    %137 = vector.extract_strided_slice %133 {offsets = [0, 16], sizes = [2, 16], strides = [1, 1]} : vector<2x64xf32> to vector<2x16xf32>
    %138 = vector.extract_strided_slice %133 {offsets = [0, 48], sizes = [2, 16], strides = [1, 1]} : vector<2x64xf32> to vector<2x16xf32>
    %139 = arith.mulf %137, %121 : vector<2x16xf32>
    %140 = arith.mulf %136, %135 : vector<2x16xf32>
    %141 = arith.addf %139, %140 : vector<2x16xf32>
    %142 = math.tanh %141 : vector<2x16xf32>
    %143 = arith.mulf %138, %142 : vector<2x16xf32>
    %c2_64 = arith.constant 2 : index
    %c0_65 = arith.constant 0 : index
    %c0_66 = arith.constant 0 : index
    %144 = vector.load %arg17[%c2_64, %c0_65, %c0_66] : memref<8x2x64xf32, #tpu.memory_space<vmem>>, vector<1x2x64xf32>
    %145 = vector.shape_cast %144 : vector<1x2x64xf32> to vector<2x64xf32>
    %cst_67 = arith.constant dense<0.000000e+00> : vector<2x64xf32>
    %146 = tpu.matmul %143, %110, %cst_67 {dimension_numbers = #tpu.dot_dimension_numbers<[1], [0], [0], [1], [0, 0, 1, 1], [], []>} : vector<2x16xf32>, vector<16x64xf32>, vector<2x64xf32> -> vector<2x64xf32>
    %147 = arith.addf %145, %146 : vector<2x64xf32>
    %148 = arith.negf %147 : vector<2x64xf32>
    %149 = math.exp %148 : vector<2x64xf32>
    %cst_68 = arith.constant 1.000000e+00 : f32
    %150 = vector.broadcast %cst_68 : f32 to vector<2x64xf32>
    %151 = arith.addf %150, %149 : vector<2x64xf32>
    %152 = arith.divf %150, %151 : vector<2x64xf32>
    %153 = vector.extract_strided_slice %147 {offsets = [0, 32], sizes = [2, 16], strides = [1, 1]} : vector<2x64xf32> to vector<2x16xf32>
    %154 = math.tanh %153 : vector<2x16xf32>
    %155 = vector.extract_strided_slice %152 {offsets = [0, 0], sizes = [2, 16], strides = [1, 1]} : vector<2x64xf32> to vector<2x16xf32>
    %156 = vector.extract_strided_slice %152 {offsets = [0, 16], sizes = [2, 16], strides = [1, 1]} : vector<2x64xf32> to vector<2x16xf32>
    %157 = vector.extract_strided_slice %152 {offsets = [0, 48], sizes = [2, 16], strides = [1, 1]} : vector<2x64xf32> to vector<2x16xf32>
    %158 = arith.mulf %156, %141 : vector<2x16xf32>
    %159 = arith.mulf %155, %154 : vector<2x16xf32>
    %160 = arith.addf %158, %159 : vector<2x16xf32>
    %161 = math.tanh %160 : vector<2x16xf32>
    %162 = arith.mulf %157, %161 : vector<2x16xf32>
    %c3_69 = arith.constant 3 : index
    %c0_70 = arith.constant 0 : index
    %c0_71 = arith.constant 0 : index
    %163 = vector.load %arg17[%c3_69, %c0_70, %c0_71] : memref<8x2x64xf32, #tpu.memory_space<vmem>>, vector<1x2x64xf32>
    %164 = vector.shape_cast %163 : vector<1x2x64xf32> to vector<2x64xf32>
    %cst_72 = arith.constant dense<0.000000e+00> : vector<2x64xf32>
    %165 = tpu.matmul %162, %110, %cst_72 {dimension_numbers = #tpu.dot_dimension_numbers<[1], [0], [0], [1], [0, 0, 1, 1], [], []>} : vector<2x16xf32>, vector<16x64xf32>, vector<2x64xf32> -> vector<2x64xf32>
    %166 = arith.addf %164, %165 : vector<2x64xf32>
    %167 = arith.negf %166 : vector<2x64xf32>
    %168 = math.exp %167 : vector<2x64xf32>
    %cst_73 = arith.constant 1.000000e+00 : f32
    %169 = vector.broadcast %cst_73 : f32 to vector<2x64xf32>
    %170 = arith.addf %169, %168 : vector<2x64xf32>
    %171 = arith.divf %169, %170 : vector<2x64xf32>
    %172 = vector.extract_strided_slice %166 {offsets = [0, 32], sizes = [2, 16], strides = [1, 1]} : vector<2x64xf32> to vector<2x16xf32>
    %173 = math.tanh %172 : vector<2x16xf32>
    %174 = vector.extract_strided_slice %171 {offsets = [0, 0], sizes = [2, 16], strides = [1, 1]} : vector<2x64xf32> to vector<2x16xf32>
    %175 = vector.extract_strided_slice %171 {offsets = [0, 16], sizes = [2, 16], strides = [1, 1]} : vector<2x64xf32> to vector<2x16xf32>
    %176 = vector.extract_strided_slice %171 {offsets = [0, 48], sizes = [2, 16], strides = [1, 1]} : vector<2x64xf32> to vector<2x16xf32>
    %177 = arith.mulf %175, %160 : vector<2x16xf32>
    %178 = arith.mulf %174, %173 : vector<2x16xf32>
    %179 = arith.addf %177, %178 : vector<2x16xf32>
    %180 = math.tanh %179 : vector<2x16xf32>
    %181 = arith.mulf %176, %180 : vector<2x16xf32>
    %c4_74 = arith.constant 4 : index
    %c0_75 = arith.constant 0 : index
    %c0_76 = arith.constant 0 : index
    %182 = vector.load %arg17[%c4_74, %c0_75, %c0_76] : memref<8x2x64xf32, #tpu.memory_space<vmem>>, vector<1x2x64xf32>
    %183 = vector.shape_cast %182 : vector<1x2x64xf32> to vector<2x64xf32>
    %cst_77 = arith.constant dense<0.000000e+00> : vector<2x64xf32>
    %184 = tpu.matmul %181, %110, %cst_77 {dimension_numbers = #tpu.dot_dimension_numbers<[1], [0], [0], [1], [0, 0, 1, 1], [], []>} : vector<2x16xf32>, vector<16x64xf32>, vector<2x64xf32> -> vector<2x64xf32>
    %185 = arith.addf %183, %184 : vector<2x64xf32>
    %186 = arith.negf %185 : vector<2x64xf32>
    %187 = math.exp %186 : vector<2x64xf32>
    %cst_78 = arith.constant 1.000000e+00 : f32
    %188 = vector.broadcast %cst_78 : f32 to vector<2x64xf32>
    %189 = arith.addf %188, %187 : vector<2x64xf32>
    %190 = arith.divf %188, %189 : vector<2x64xf32>
    %191 = vector.extract_strided_slice %185 {offsets = [0, 32], sizes = [2, 16], strides = [1, 1]} : vector<2x64xf32> to vector<2x16xf32>
    %192 = math.tanh %191 : vector<2x16xf32>
    %193 = vector.extract_strided_slice %190 {offsets = [0, 0], sizes = [2, 16], strides = [1, 1]} : vector<2x64xf32> to vector<2x16xf32>
    %194 = vector.extract_strided_slice %190 {offsets = [0, 16], sizes = [2, 16], strides = [1, 1]} : vector<2x64xf32> to vector<2x16xf32>
    %195 = vector.extract_strided_slice %190 {offsets = [0, 48], sizes = [2, 16], strides = [1, 1]} : vector<2x64xf32> to vector<2x16xf32>
    %196 = arith.mulf %194, %179 : vector<2x16xf32>
    %197 = arith.mulf %193, %192 : vector<2x16xf32>
    %198 = arith.addf %196, %197 : vector<2x16xf32>
    %199 = math.tanh %198 : vector<2x16xf32>
    %200 = arith.mulf %195, %199 : vector<2x16xf32>
    %c5_79 = arith.constant 5 : index
    %c0_80 = arith.constant 0 : index
    %c0_81 = arith.constant 0 : index
    %201 = vector.load %arg17[%c5_79, %c0_80, %c0_81] : memref<8x2x64xf32, #tpu.memory_space<vmem>>, vector<1x2x64xf32>
    %202 = vector.shape_cast %201 : vector<1x2x64xf32> to vector<2x64xf32>
    %cst_82 = arith.constant dense<0.000000e+00> : vector<2x64xf32>
    %203 = tpu.matmul %200, %110, %cst_82 {dimension_numbers = #tpu.dot_dimension_numbers<[1], [0], [0], [1], [0, 0, 1, 1], [], []>} : vector<2x16xf32>, vector<16x64xf32>, vector<2x64xf32> -> vector<2x64xf32>
    %204 = arith.addf %202, %203 : vector<2x64xf32>
    %205 = arith.negf %204 : vector<2x64xf32>
    %206 = math.exp %205 : vector<2x64xf32>
    %cst_83 = arith.constant 1.000000e+00 : f32
    %207 = vector.broadcast %cst_83 : f32 to vector<2x64xf32>
    %208 = arith.addf %207, %206 : vector<2x64xf32>
    %209 = arith.divf %207, %208 : vector<2x64xf32>
    %210 = vector.extract_strided_slice %204 {offsets = [0, 32], sizes = [2, 16], strides = [1, 1]} : vector<2x64xf32> to vector<2x16xf32>
    %211 = math.tanh %210 : vector<2x16xf32>
    %212 = vector.extract_strided_slice %209 {offsets = [0, 0], sizes = [2, 16], strides = [1, 1]} : vector<2x64xf32> to vector<2x16xf32>
    %213 = vector.extract_strided_slice %209 {offsets = [0, 16], sizes = [2, 16], strides = [1, 1]} : vector<2x64xf32> to vector<2x16xf32>
    %214 = vector.extract_strided_slice %209 {offsets = [0, 48], sizes = [2, 16], strides = [1, 1]} : vector<2x64xf32> to vector<2x16xf32>
    %215 = arith.mulf %213, %198 : vector<2x16xf32>
    %216 = arith.mulf %212, %211 : vector<2x16xf32>
    %217 = arith.addf %215, %216 : vector<2x16xf32>
    %218 = math.tanh %217 : vector<2x16xf32>
    %219 = arith.mulf %214, %218 : vector<2x16xf32>
    %c6_84 = arith.constant 6 : index
    %c0_85 = arith.constant 0 : index
    %c0_86 = arith.constant 0 : index
    %220 = vector.load %arg17[%c6_84, %c0_85, %c0_86] : memref<8x2x64xf32, #tpu.memory_space<vmem>>, vector<1x2x64xf32>
    %221 = vector.shape_cast %220 : vector<1x2x64xf32> to vector<2x64xf32>
    %cst_87 = arith.constant dense<0.000000e+00> : vector<2x64xf32>
    %222 = tpu.matmul %219, %110, %cst_87 {dimension_numbers = #tpu.dot_dimension_numbers<[1], [0], [0], [1], [0, 0, 1, 1], [], []>} : vector<2x16xf32>, vector<16x64xf32>, vector<2x64xf32> -> vector<2x64xf32>
    %223 = arith.addf %221, %222 : vector<2x64xf32>
    %224 = arith.negf %223 : vector<2x64xf32>
    %225 = math.exp %224 : vector<2x64xf32>
    %cst_88 = arith.constant 1.000000e+00 : f32
    %226 = vector.broadcast %cst_88 : f32 to vector<2x64xf32>
    %227 = arith.addf %226, %225 : vector<2x64xf32>
    %228 = arith.divf %226, %227 : vector<2x64xf32>
    %229 = vector.extract_strided_slice %223 {offsets = [0, 32], sizes = [2, 16], strides = [1, 1]} : vector<2x64xf32> to vector<2x16xf32>
    %230 = math.tanh %229 : vector<2x16xf32>
    %231 = vector.extract_strided_slice %228 {offsets = [0, 0], sizes = [2, 16], strides = [1, 1]} : vector<2x64xf32> to vector<2x16xf32>
    %232 = vector.extract_strided_slice %228 {offsets = [0, 16], sizes = [2, 16], strides = [1, 1]} : vector<2x64xf32> to vector<2x16xf32>
    %233 = vector.extract_strided_slice %228 {offsets = [0, 48], sizes = [2, 16], strides = [1, 1]} : vector<2x64xf32> to vector<2x16xf32>
    %234 = arith.mulf %232, %217 : vector<2x16xf32>
    %235 = arith.mulf %231, %230 : vector<2x16xf32>
    %236 = arith.addf %234, %235 : vector<2x16xf32>
    %237 = math.tanh %236 : vector<2x16xf32>
    %238 = arith.mulf %233, %237 : vector<2x16xf32>
    %c7_89 = arith.constant 7 : index
    %c0_90 = arith.constant 0 : index
    %c0_91 = arith.constant 0 : index
    %239 = vector.load %arg17[%c7_89, %c0_90, %c0_91] : memref<8x2x64xf32, #tpu.memory_space<vmem>>, vector<1x2x64xf32>
    %240 = vector.shape_cast %239 : vector<1x2x64xf32> to vector<2x64xf32>
    %cst_92 = arith.constant dense<0.000000e+00> : vector<2x64xf32>
    %241 = tpu.matmul %238, %110, %cst_92 {dimension_numbers = #tpu.dot_dimension_numbers<[1], [0], [0], [1], [0, 0, 1, 1], [], []>} : vector<2x16xf32>, vector<16x64xf32>, vector<2x64xf32> -> vector<2x64xf32>
    %242 = arith.addf %240, %241 : vector<2x64xf32>
    %243 = arith.negf %242 : vector<2x64xf32>
    %244 = math.exp %243 : vector<2x64xf32>
    %cst_93 = arith.constant 1.000000e+00 : f32
    %245 = vector.broadcast %cst_93 : f32 to vector<2x64xf32>
    %246 = arith.addf %245, %244 : vector<2x64xf32>
    %247 = arith.divf %245, %246 : vector<2x64xf32>
    %248 = vector.extract_strided_slice %242 {offsets = [0, 32], sizes = [2, 16], strides = [1, 1]} : vector<2x64xf32> to vector<2x16xf32>
    %249 = math.tanh %248 : vector<2x16xf32>
    %250 = vector.extract_strided_slice %247 {offsets = [0, 0], sizes = [2, 16], strides = [1, 1]} : vector<2x64xf32> to vector<2x16xf32>
    %251 = vector.extract_strided_slice %247 {offsets = [0, 16], sizes = [2, 16], strides = [1, 1]} : vector<2x64xf32> to vector<2x16xf32>
    %252 = vector.extract_strided_slice %247 {offsets = [0, 48], sizes = [2, 16], strides = [1, 1]} : vector<2x64xf32> to vector<2x16xf32>
    %253 = arith.mulf %251, %236 : vector<2x16xf32>
    %254 = arith.mulf %250, %249 : vector<2x16xf32>
    %255 = arith.addf %253, %254 : vector<2x16xf32>
    %256 = math.tanh %255 : vector<2x16xf32>
    %257 = arith.mulf %252, %256 : vector<2x16xf32>
    %c0_94 = arith.constant 0 : index
    %c0_95 = arith.constant 0 : index
    %258 = vector.load %arg13[%c0_94, %c0_95] : memref<16x128xf32, #tpu.memory_space<vmem>>, vector<16x128xf32>
    %cst_96 = arith.constant dense<0.000000e+00> : vector<2x128xf32>
    %259 = tpu.matmul %257, %258, %cst_96 {dimension_numbers = #tpu.dot_dimension_numbers<[1], [0], [0], [1], [0, 0, 1, 1], [], []>} : vector<2x16xf32>, vector<16x128xf32>, vector<2x128xf32> -> vector<2x128xf32>
    %c0_97 = arith.constant 0 : index
    %c0_98 = arith.constant 0 : index
    %260 = vector.load %arg14[%c0_97, %c0_98] : memref<16x128xf32, #tpu.memory_space<vmem>>, vector<16x128xf32>
    %cst_99 = arith.constant dense<0.000000e+00> : vector<2x128xf32>
    %261 = tpu.matmul %255, %260, %cst_99 {dimension_numbers = #tpu.dot_dimension_numbers<[1], [0], [0], [1], [0, 0, 1, 1], [], []>} : vector<2x16xf32>, vector<16x128xf32>, vector<2x128xf32> -> vector<2x128xf32>
    %262 = arith.addf %259, %261 : vector<2x128xf32>
    %c0_100 = arith.constant 0 : index
    %c0_101 = arith.constant 0 : index
    %263 = vector.load %arg15[%c0_100, %c0_101] : memref<1x128xf32, #tpu.memory_space<vmem>>, vector<1x128xf32>
    %264 = vector.broadcast %263 : vector<1x128xf32> to vector<2x128xf32>
    %265 = arith.addf %262, %264 : vector<2x128xf32>
    %c0_102 = arith.constant 0 : index
    %c0_103 = arith.constant 0 : index
    %266 = vector.load %arg16[%c0_102, %c0_103] : memref<2x128xf32, #tpu.memory_space<vmem>>, vector<2x128xf32>
    tpu.vector_store %arg16[%c0_102, %c0_103], %265 {strides = array<i32>} : memref<2x128xf32, #tpu.memory_space<vmem>>, vector<2x128xf32>,
    return
  }
  func.func @transform_0(%arg0: i32) -> (i32, i32, i32) {
    %c0_i32 = arith.constant 0 : i32
    %c0_i32_0 = arith.constant 0 : i32
    %c0_i32_1 = arith.constant 0 : i32
    return %arg0, %c0_i32, %c0_i32_0 : i32, i32, i32
  }
  func.func @transform_1(%arg0: i32) -> (i32, i32) {
    %c0_i32 = arith.constant 0 : i32
    %c0_i32_0 = arith.constant 0 : i32
    %c0_i32_1 = arith.constant 0 : i32
    return %c0_i32, %c0_i32_0 : i32, i32
  }
  func.func @transform_2(%arg0: i32) -> (i32, i32) {
    %c0_i32 = arith.constant 0 : i32
    %c0_i32_0 = arith.constant 0 : i32
    %c0_i32_1 = arith.constant 0 : i32
    return %c0_i32, %c0_i32_0 : i32, i32
  }
  func.func @transform_3(%arg0: i32) -> (i32, i32) {
    %c0_i32 = arith.constant 0 : i32
    %c0_i32_0 = arith.constant 0 : i32
    %c0_i32_1 = arith.constant 0 : i32
    return %c0_i32, %c0_i32_0 : i32, i32
  }
  func.func @transform_4(%arg0: i32) -> (i32, i32) {
    %c0_i32 = arith.constant 0 : i32
    %c0_i32_0 = arith.constant 0 : i32
    %c0_i32_1 = arith.constant 0 : i32
    return %c0_i32, %c0_i32_0 : i32, i32
  }
  func.func @transform_5(%arg0: i32) -> (i32, i32) {
    %c0_i32 = arith.constant 0 : i32
    %c0_i32_0 = arith.constant 0 : i32
    %c0_i32_1 = arith.constant 0 : i32
    return %c0_i32, %c0_i32_0 : i32, i32
  }
  func.func @transform_6(%arg0: i32) -> (i32, i32) {
    %c0_i32 = arith.constant 0 : i32
    %c0_i32_0 = arith.constant 0 : i32
    %c0_i32_1 = arith.constant 0 : i32
    return %c0_i32, %c0_i32_0 : i32, i32
  }
  func.func @transform_7(%arg0: i32) -> (i32, i32) {
    %c0_i32 = arith.constant 0 : i32
    %c0_i32_0 = arith.constant 0 : i32
    %c0_i32_1 = arith.constant 0 : i32
    return %c0_i32, %c0_i32_0 : i32, i32
  }
  func.func @transform_8(%arg0: i32) -> (i32, i32) {
    %c0_i32 = arith.constant 0 : i32
    %c0_i32_0 = arith.constant 0 : i32
    %c0_i32_1 = arith.constant 0 : i32
    return %c0_i32, %c0_i32_0 : i32, i32
  }
  func.func @transform_9(%arg0: i32) -> (i32, i32) {
    %c0_i32 = arith.constant 0 : i32
    %c0_i32_0 = arith.constant 0 : i32
    %c0_i32_1 = arith.constant 0 : i32
    return %c0_i32, %c0_i32_0 : i32, i32
  }
  func.func @transform_10(%arg0: i32) -> (i32, i32) {
    %c0_i32 = arith.constant 0 : i32
    %c0_i32_0 = arith.constant 0 : i32
    %c0_i32_1 = arith.constant 0 : i32
    return %c0_i32, %c0_i32_0 : i32, i32
  }
  func.func @transform_11(%arg0: i32) -> (i32, i32) {
    %c0_i32 = arith.constant 0 : i32
    %c0_i32_0 = arith.constant 0 : i32
    %c0_i32_1 = arith.constant 0 : i32
    return %c0_i32, %c0_i32_0 : i32, i32
  }
  func.func @transform_12(%arg0: i32) -> (i32, i32) {
    %c0_i32 = arith.constant 0 : i32
    %c0_i32_0 = arith.constant 0 : i32
    %c0_i32_1 = arith.constant 0 : i32
    return %c0_i32, %c0_i32_0 : i32, i32
  }
  func.func @transform_13(%arg0: i32) -> (i32, i32) {
    %c0_i32 = arith.constant 0 : i32
    %c0_i32_0 = arith.constant 0 : i32
    %c0_i32_1 = arith.constant 0 : i32
    return %c0_i32, %c0_i32_0 : i32, i32
  }
  func.func @transform_14(%arg0: i32) -> (i32, i32) {
    %c0_i32 = arith.constant 0 : i32
    %c0_i32_0 = arith.constant 0 : i32
    %c0_i32_1 = arith.constant 0 : i32
    return %c0_i32, %c0_i32_0 : i32, i32
  }
  func.func @transform_15(%arg0: i32) -> (i32, i32) {
    %c0_i32 = arith.constant 0 : i32
    %c0_i32_0 = arith.constant 0 : i32
    return %arg0, %c0_i32 : i32, i32
  }
}

</mosaic_0001>

<bundles_post_ra>
// kernel: tpu_custom_call.1
= control target key start
LH: loop header
LB: loop body
LE: loop exit
PB: predicated region body
PF: predicated region fallthrough
CT: control target
= control target key end

     0   :  { %20 = vsyncpa [#allocation4], 0  ;;  %s2227_s0 = inlined_call_operand.vmem [shape: f32[2,8,32], index: 0, kind: input, shape index: {}]   ;;  %s2228_s1 = inlined_call_operand.vmem [shape: f32[32,64], index: 1, kind: input, shape index: {}]   ;;  %s2229_s2 = inlined_call_operand.vmem [shape: f32[1,64], index: 2, kind: input, shape index: {}]   ;;  %s2230_s3 = inlined_call_operand.vmem [shape: f32[1,64], index: 3, kind: input, shape index: {}]   ;;  %s2231_s4 = inlined_call_operand.hbm [shape: f32[1,64], index: 4, kind: input, shape index: {}]   ;;  %s2232_s5 = inlined_call_operand.vmem [shape: f32[64,32], index: 5, kind: input, shape index: {}]   ;;  %s2233_s6 = inlined_call_operand.hbm [shape: f32[1,32], index: 6, kind: input, shape index: {}]   ;;  %s2234_s7 = inlined_call_operand.hbm [shape: f32[1,32], index: 7, kind: input, shape index: {}]   ;;  %s2235_s8 = inlined_call_operand.hbm [shape: f32[1,32], index: 8, kind: input, shape index: {}]   ;;  %s2236_s9 = inlined_call_operand.vmem [shape: f32[32,64], index: 9, kind: input, shape index: {}]   ;;  %s2237_s10 = inlined_call_operand.vmem [shape: f32[16,64], index: 10, kind: input, shape index: {}]   ;;  %s2238_s11 = inlined_call_operand.vmem [shape: f32[1,64], index: 11, kind: input, shape index: {}]   ;;  %s2239_s12 = inlined_call_operand.vmem [shape: f32[16,128], index: 12, kind: input, shape index: {}]   ;;  %s2240_s13 = inlined_call_operand.vmem [shape: f32[16,128], index: 13, kind: input, shape index: {}]   ;;  %s2241_s14 = inlined_call_operand.vmem [shape: f32[1,128], index: 14, kind: input, shape index: {}]   ;;  %s2242_s15 = inlined_call_operand.hbm [shape: f32[2,128], index: 15, kind: output, shape index: {}]  }
   0x1   :  { %21 = vsyncpa [#allocation7], 0 }
   0x2   :  { %22 = vsyncpa [#allocation10], 0 }
   0x3   :  { %23 = vsyncpa [#allocation5], 0  ;;  %s1887_s18 = smov [#allocation6]   ;;  %s1888_s20 = smov [#allocation3]  }
   0x4   :  { %s50_s19 = sshll.u32 %s1887_s18, 4  ;;  %s38_s21 = sshll.u32 %s1888_s20, 4  ;;  %s51_s19 = int_to_ptr.vmem [resolvable:$true] %s50_s19  ;;  %s39_s21 = int_to_ptr.vmem [resolvable:$true] %s38_s21 }
   0x5   :  { %s1769_s24 = scalar_lea.hbm %s2233_s6, 16 }
   0x6   :  { %p1770_p0 = scmp.ne.s32.totalorder %s2233_s6, %s1769_s24  ;;  %p1773_p1 = scmp.lt.u32.totalorder %s1769_s24, %s2233_s6 }
   0x8   :  { %p1775_p2 = pnand %p1773_p1, %p1770_p0 }
   0xa   :  { %1778 = shalt.err (!%p1775_p2)
}
   0xb   :  { %s1779_s29 = scalar_lea.vmem %s51_s19, 16  ;;  %s1783_s30 = scalar_lea.vmem %s51_s19, 32 }
   0xc   :  { %p1780_p3 = scmp.ne.s32.totalorder %s51_s19, %s1779_s29  ;;  %p1784_p4 = scmp.lt.s32.totalorder %s51_s19, %s51_s19 }
   0xd   :  { %p1785_p5 = scmp.lt.s32.totalorder %s1783_s30, %s1779_s29 }
   0xf   :  { %p1786_p6 = por %p1785_p5, %p1784_p4 }
  0x11   :  { %p1787_p7 = pnand %p1786_p6, %p1780_p3 }
  0x13   :  { %1790 = shalt.err (!%p1787_p7)
}
  0x14   :  { %53 = dma.hbm_to_vmem [thread:$0]  %s2233_s6, 16, %s51_s19, [#allocation7]  }
  0x15   :  { %s1791_s22 = scalar_lea.hbm %s2231_s4, 16 }
  0x16   :  { %p1792_p8 = scmp.ne.s32.totalorder %s2231_s4, %s1791_s22  ;;  %p1795_p9 = scmp.lt.u32.totalorder %s1791_s22, %s2231_s4 }
  0x18   :  { %p1797_p10 = pnand %p1795_p9, %p1792_p8 }
  0x1a   :  { %1800 = shalt.err (!%p1797_p10)
}
  0x1b   :  { %s1801_s27 = scalar_lea.vmem %s39_s21, 16  ;;  %s1805_s28 = scalar_lea.vmem %s39_s21, 32 }
  0x1c   :  { %p1802_p11 = scmp.ne.s32.totalorder %s39_s21, %s1801_s27  ;;  %p1806_p12 = scmp.lt.s32.totalorder %s39_s21, %s39_s21 }
  0x1d   :  { %p1807_p13 = scmp.lt.s32.totalorder %s1805_s28, %s1801_s27 }
  0x1f   :  { %p1808_p0 = por %p1807_p13, %p1806_p12 }
  0x21   :  { %p1809_p1 = pnand %p1808_p0, %p1802_p11 }
  0x23   :  { %1812 = shalt.err (!%p1809_p1)
}
  0x24   :  { %41 = dma.hbm_to_vmem [thread:$0]  %s2231_s4, 16, %s39_s21, [#allocation4]  }
  0x25   :  { %s1889_s29 = smov [#allocation8]   ;;  %s1890_s16 = smov [#allocation9]  }
  0x26   :  { %s60_s30 = sshll.u32 %s1889_s29, 4  ;;  %s70_s17 = sshll.u32 %s1890_s16, 4  ;;  %s61_s30 = int_to_ptr.vmem [resolvable:$true] %s60_s30  ;;  %s71_s17 = int_to_ptr.vmem [resolvable:$true] %s70_s17 }
  0x27   :  { %s1813_s22 = scalar_lea.hbm %s2234_s7, 16 }
  0x28   :  { %p1814_p2 = scmp.ne.s32.totalorder %s2234_s7, %s1813_s22  ;;  %p1817_p3 = scmp.lt.u32.totalorder %s1813_s22, %s2234_s7 }
  0x2a   :  { %p1819_p4 = pnand %p1817_p3, %p1814_p2 }
  0x2c   :  { %1822 = shalt.err (!%p1819_p4)
}
  0x2d   :  { %s1823_s4 = scalar_lea.vmem %s61_s30, 16  ;;  %s1827_s21 = scalar_lea.vmem %s61_s30, 32 }
  0x2e   :  { %p1824_p5 = scmp.ne.s32.totalorder %s61_s30, %s1823_s4  ;;  %p1828_p6 = scmp.lt.s32.totalorder %s61_s30, %s61_s30 }
  0x2f   :  { %p1829_p7 = scmp.lt.s32.totalorder %s1827_s21, %s1823_s4 }
  0x31   :  { %p1830_p8 = por %p1829_p7, %p1828_p6 }
  0x33   :  { %p1831_p9 = pnand %p1830_p8, %p1824_p5 }
  0x35   :  { %1834 = shalt.err (!%p1831_p9)
}
  0x36   :  { %63 = dma.hbm_to_vmem [thread:$0]  %s2234_s7, 16, %s61_s30, [#allocation7]  }
  0x37   :  { %s1835_s29 = scalar_lea.hbm %s2235_s8, 16 }
  0x38   :  { %p1836_p10 = scmp.ne.s32.totalorder %s2235_s8, %s1835_s29  ;;  %p1839_p11 = scmp.lt.u32.totalorder %s1835_s29, %s2235_s8 }
  0x3a   :  { %p1841_p12 = pnand %p1839_p11, %p1836_p10 }
  0x3c   :  { %1844 = shalt.err (!%p1841_p12)
}
  0x3d   :  { %s1845_s23 = scalar_lea.vmem %s71_s17, 16  ;;  %s1849_s24 = scalar_lea.vmem %s71_s17, 32 }
  0x3e   :  { %p1846_p13 = scmp.ne.s32.totalorder %s71_s17, %s1845_s23  ;;  %p1850_p0 = scmp.lt.s32.totalorder %s71_s17, %s71_s17 }
  0x3f   :  { %p1851_p1 = scmp.lt.s32.totalorder %s1849_s24, %s1845_s23 }
  0x41   :  { %p1852_p2 = por %p1851_p1, %p1850_p0 }
  0x43   :  { %p1853_p3 = pnand %p1852_p2, %p1846_p13 }
  0x45   :  { %1856 = shalt.err (!%p1853_p3)
}
  0x46   :  { %73 = dma.hbm_to_vmem [thread:$0]  %s2235_s8, 16, %s71_s17, [#allocation10]  }
  0x47   :  { %1879 = dma.done.wait [#allocation4], 16  }
  0x48   :  { %1880 = vsyncadd [#allocation4], 4294967280 }
  0x49   :  { %1881 = dma.done.wait [#allocation7], 32  }
  0x4a   :  { %1882 = vsyncadd [#allocation7], 4294967264 }
  0x4b   :  { %1883 = dma.done.wait [#allocation10], 16  }
  0x4c   :  { %1884 = vsyncadd [#allocation10], 4294967280  ;;  %vm111_vm0 = vcmask 261120   ;;  %v100_v0 = vld [vmem:[%s2228_s1] sm:$0xff]  ;;  %v101_v1 = vld [vmem:[%s2228_s1 + $0x8] sm:$0xff]  ;;  %vm195_vm1 = vcmask 523264  }
  0x4d   :  { %v102_v2 = vld [vmem:[%s2228_s1 + $0x10] sm:$0xff]  ;;  %v1624_v3 = vpack.c.bf16 %v101_v1, %v100_v0  ;;  %v103_v4 = vld [vmem:[%s2228_s1 + $0x18] sm:$0xff]  ;;  %v98_v5 = vld [vmem:[%s2227_s0] sm:$0xff]  ;;  %vm525_vm2 = vcmask 516096   ;;  %vm479_vm3 = vcmask 1041409   ;;  %vm484_vm4 = vcmask 1042434  }
  0x4e   :  { %v1628_v6 = vpack.c.bf16 %v103_v4, %v102_v2  ;;  %1528 = vmatprep.mubr.msk.f32.mxu0 %vm111_vm0, %v98_v5  ;;  %v99_v7 = vld [vmem:[%s2227_s0 + $0x8] sm:$0xff]  ;;  %v1440_v8 = vld [vmem:[%s2229_s2] ss:$0 sm:$0xff]  ;;  %v243_v27 = vld [vmem:[%s2232_s5 + $0x10] sm:$0xff]  ;;  %vm490_vm5 = vcmask 1043459   ;;  %vm482_vm6 = vcmask 517120  }
  0x4f   :  { %1625 = vmatprep.subr.bf16.mxu0 %v1624_v3  ;;  %v241_v25 = vld [vmem:[%s2232_s5] sm:$0xff]  ;;  %v242_v26 = vld [vmem:[%s2232_s5 + $0x8] sm:$0xff]  ;;  %v244_v29 = vld [vmem:[%s2232_s5 + $0x18] sm:$0xff]  ;;  %vm496_vm7 = vcmask 1044484   ;;  %vm523_vm8 = vcmask 523271   ;;  %vm502_vm9 = vcmask 1045509  }
  0x50   :  { %1627 = vmatpush3.bf16.msra.mxu0 %v1624_v3  ;;  %v1632_v28 = vpack.c.bf16 %v242_v26, %v241_v25  ;;  %v1636_v30 = vpack.c.bf16 %v244_v29, %v243_v27  ;;  %v245_v31 = vld [vmem:[%s2232_s5 + $0x20] sm:$0xff]  ;;  %v246_v32 = vld [vmem:[%s2232_s5 + $0x28] sm:$0xff]  ;;  %v247_v34 = vld [vmem:[%s2232_s5 + $0x30] sm:$0xff]  ;;  %vm508_vm10 = vcmask 1046534   ;;  %vm514_vm11 = vcmask 1047559   ;;  %s1892_s22 = smov 16  }
  0x51   :  { %1629 = vmatprep.subr.bf16.mxu0 %v1628_v6  ;;  %v1640_v33 = vpack.c.bf16 %v246_v32, %v245_v31  ;;  %v248_v35 = vld [vmem:[%s2232_s5 + $0x38] sm:$0xff]  ;;  %v1443_v44 = vld [vmem:[%s2230_s3] ss:$0 sm:$0xff]  ;;  %v1444_v46 = vld [vmem:[#allocation3] ss:$0 sm:$0xff]  ;;  %vm488_vm12 = vcmask 518145  }
  0x52   :  { %1633 = vmatprep.subr.bf16.mxu1 %v1632_v28  ;;  %v1644_v36 = vpack.c.bf16 %v248_v35, %v247_v34  ;;  %v1445_v55 = vld [vmem:[#allocation6] ss:$0 sm:$0xff]  ;;  %v1450_v32 = vld [vmem:[%s2238_s11] ss:$0 sm:$0xff]  ;;  %vm494_vm13 = vcmask 519170   ;;  %vm500_vm14 = vcmask 520195  }
  0x53   :  { %1635 = vmatpush3.bf16.msra.mxu1 %v1632_v28  ;;  %vm506_vm15 = vcmask 521220   ;;  %s1891_s11 = smov 96   ;;  %s1897_s25 = smov 80  }
  0x54   :  { %1631 = vmatpush3.bf16.msra.mxu0 %v1628_v6  ;;  %1637 = vmatprep.subr.bf16.mxu1 %v1636_v30  ;;  %s1898_s26 = smov 32   ;;  %s1899_s8 = smov 112  }
  0x55   :  { %s1900_s5 = smov [#allocation11]  }
  0x56   :  { %s1429_s29 = sshll.u32 %s1900_s5, 4  ;;  %s1430_s29 = int_to_ptr.vmem [resolvable:$true] %s1429_s29 }
  0x57   :  { %1529 = vmatmul.mubr.msk.f32.vlgmr.msra.gmra.mrb[0].mxu0 %vm111_vm0, %v99_v7  ;;  %1639 = vmatpush3.bf16.msra.mxu1 %v1636_v30  ;;  %s1857_s16 = scalar_lea.vmem %s1430_s29, 32  ;;  %p1862_p5 = scmp.lt.s32.totalorder %s1430_s29, %s1430_s29 }
  0x58   :  { %1641 = vmatprep.subr.bf16.mxu1 %v1640_v33  ;;  %p1858_p4 = scmp.ne.s32.totalorder %s1430_s29, %s1857_s16  ;;  %p1863_p6 = scmp.lt.s32.totalorder %s1857_s16, %s1857_s16 }
  0x5a   :  { %p1864_p7 = por %p1863_p6, %p1862_p5 }
  0x5b   :  { %1643 = vmatpush3.bf16.msra.mxu1 %v1640_v33 }
  0x5c   :  { %1645 = vmatprep.subr.bf16.mxu1 %v1644_v36  ;;  %p1865_p8 = pnand %p1864_p7, %p1858_p4 }
  0x5f   :  { %1647 = vmatpush3.bf16.msra.mxu1 %v1644_v36 }
 0x12a   :  { %v1530_v9 = vpop.f32.mrb[0].mxu0 }
 0x12b   :  { %v184_v10 = vpop.f32.mrb[1].mxu0  ;;  %v190_v12 = vadd.f32 %v1530_v9, %v1440_v8  ;;  %v385_v9 = vld [vmem:[%s2236_s9 + $0x8] sm:$0xff] }
 0x12c   :  { %v185_v11 = vadd.f32 %v1440_v8, %v184_v10  ;;  %v384_v8 = vld [vmem:[%s2236_s9] sm:$0xff] }
 0x12d   :  { %v199_v14 = vsel %vm195_vm1, %v190_v12, 0.0  ;;  %v1648_v10 = vpack.c.bf16 %v385_v9, %v384_v8 }
 0x12e   :  { %v196_v13 = vsel %vm195_vm1, %v185_v11, 0.0 }
 0x12f   :  { %197 = vadd.xlane.f32.xlu0 %v196_v13  ;;  %1649 = vmatprep.subr.bf16.mxu0 %v1648_v10 }
 0x130   :  { %1651 = vmatpush3.bf16.msra.mxu0 %v1648_v10 }
 0x133   :  { %200 = vadd.xlane.f32.xlu0 %v199_v14 }
 0x1bc   :  { %v198_v15 = vpop.xlane.xlu0 %197 }
 0x1bd   :  { %v203_v16 = vmul.f32 0.015625, %v198_v15 }
 0x1bf   :  { %v205_v17 = vsub.f32 %v185_v11, %v203_v16  ;;  %v386_v11 = vld [vmem:[%s2236_s9 + $0x10] sm:$0xff] }
 0x1c0   :  { %v201_v18 = vpop.xlane.xlu0 %200 }
 0x1c1   :  { %v204_v19 = vmul.f32 0.015625, %v201_v18  ;;  %v207_v20 = vmul.f32 %v205_v17, %v205_v17 }
 0x1c3   :  { %v206_v21 = vsub.f32 %v190_v12, %v204_v19  ;;  %v209_v22 = vsel %vm195_vm1, %v207_v20, 0.0  ;;  %v387_v12 = vld [vmem:[%s2236_s9 + $0x18] sm:$0xff] }
 0x1c4   :  { %210 = vadd.xlane.f32.xlu1 %v209_v22  ;;  %v1652_v13 = vpack.c.bf16 %v387_v12, %v386_v11 }
 0x1c5   :  { %v208_v23 = vmul.f32 %v206_v21, %v206_v21 }
 0x1c6   :  { %1653 = vmatprep.subr.bf16.mxu0 %v1652_v13 }
 0x1c7   :  { %v212_v24 = vsel %vm195_vm1, %v208_v23, 0.0  ;;  %1655 = vmatpush3.bf16.msra.mxu0 %v1652_v13 }
 0x1c8   :  { %213 = vadd.xlane.f32.xlu1 %v212_v24  ;;  %v1449_v24 = vld [vmem:[#allocation9] ss:$0 sm:$0xff] }
 0x251   :  { %v211_v37 = vpop.xlane.xlu1 %210 }
 0x252   :  { %v215_v38 = vmul.f32 0.015625, %v211_v37 }
 0x254   :  { %v217_v39 = vadd.f32 1e-05, %v215_v38 }
 0x255   :  { %v214_v40 = vpop.xlane.xlu1 %213 }
 0x256   :  { %1697 = vrsqrt.f32 %v217_v39  ;;  %v216_v41 = vmul.f32 0.015625, %v214_v40 }
 0x258   :  { %v218_v42 = vadd.f32 1e-05, %v216_v41 }
 0x25a   :  { %1699 = vrsqrt.f32 %v218_v42 }
 0x260   :  { %v1698_v43 = vpop.eup %1697 }
 0x261   :  { %v221_v45 = vmul.f32 %v1698_v43, %v205_v17 }
 0x263   :  { %v229_v47 = vmul.f32 %v1443_v44, %v221_v45 }
 0x264   :  { %v1700_v48 = vpop.eup %1699 }
 0x265   :  { %v222_v49 = vmul.f32 %v1700_v48, %v206_v21  ;;  %v237_v50 = vadd.f32 %v1444_v46, %v229_v47  ;;  %v1448_v21 = vld [vmem:[#allocation8] ss:$0 sm:$0xff] }
 0x267   :  { %v230_v51 = vmul.f32 %v1443_v44, %v222_v49  ;;  %v239_v52 = vmax.f32 %v237_v50, 0.0 }
 0x269   :  { %v238_v53 = vadd.f32 %v1444_v46, %v230_v51  ;;  %1547 = vmatprep.mubr.msk.f32.mxu1 %vm195_vm1, %v239_v52 }
 0x26b   :  { %v240_v54 = vmax.f32 %v238_v53, 0.0  ;;  %v527_v53 = vld [vmem:[%s2237_s10] sm:$0xff] }
 0x26d   :  { %1548 = vmatmul.mubr.msk.f32.vlgmr.msra.gmra.mrb[0].mxu1 %vm195_vm1, %v240_v54  ;;  %vm518_vm1 = vcmask 523270   ;;  %v528_v54 = vld [vmem:[%s2237_s10 + $0x8] sm:$0xff]  ;;  %s1896_s10 = smov 48  }
 0x340   :  { %v1549_v56 = vpop.f32.mrb[0].mxu1 }
 0x341   :  { %v334_v57 = vadd.f32 %v1549_v56, %v1445_v55  ;;  %v328_v58 = vpop.f32.mrb[1].mxu1  ;;  %v2127_v56 = vpack.c.bf16 %v528_v54, %v527_v53 }
 0x342   :  { %v329_v59 = vadd.f32 %v1445_v55, %v328_v58  ;;  %v1893_v55 = vmov 0.0|0.0  }
 0x343   :  { %v342_v60 = vsel %vm111_vm0, %v334_v57, 0.0  ;;  %1656 = vmatprep.subr.bf16.mxu0 %v1893_v55  ;;  %1659 = vmatprep.subr.bf16.mxu1 %v1893_v55 }
 0x344   :  { %343 = vadd.xlane.f32.xlu1 %v342_v60  ;;  %v339_v61 = vsel %vm111_vm0, %v329_v59, 0.0  ;;  %1661 = vmatpush3.bf16.msra.mxu1 %v2127_v56 }
 0x345   :  { %340 = vadd.xlane.f32.xlu0 %v339_v61  ;;  %1665 = vmatprep.subr.bf16.mxu1 %v1893_v55 }
 0x3d1   :  { %v344_v62 = vpop.xlane.xlu1 %343 }
 0x3d2   :  { %v347_v63 = vmul.f32 0.03125, %v344_v62  ;;  %v341_v0 = vpop.xlane.xlu0 %340 }
 0x3d3   :  { %v346_v1 = vmul.f32 0.03125, %v341_v0 }
 0x3d4   :  { %v349_v2 = vsub.f32 %v334_v57, %v347_v63  ;;  %v1895_v57 = vmov 0.0  }
 0x3d5   :  { %v348_v3 = vsub.f32 %v329_v59, %v346_v1 }
 0x3d6   :  { %v351_v4 = vmul.f32 %v349_v2, %v349_v2 }
 0x3d7   :  { %v350_v5 = vmul.f32 %v348_v3, %v348_v3 }
 0x3d8   :  { %v355_v6 = vsel %vm111_vm0, %v351_v4, 0.0 }
 0x3d9   :  { %356 = vadd.xlane.f32.xlu1 %v355_v6  ;;  %v352_v7 = vsel %vm111_vm0, %v350_v5, 0.0 }
 0x3da   :  { %353 = vadd.xlane.f32.xlu0 %v352_v7 }
 0x466   :  { %v357_v14 = vpop.xlane.xlu1 %356 }
 0x467   :  { %v359_v15 = vmul.f32 0.03125, %v357_v14  ;;  %v354_v16 = vpop.xlane.xlu0 %353 }
 0x468   :  { %v358_v17 = vmul.f32 0.03125, %v354_v16 }
 0x469   :  { %v361_v18 = vadd.f32 1e-05, %v359_v15 }
 0x46a   :  { %v360_v19 = vadd.f32 1e-05, %v358_v17 }
 0x46b   :  { %1701 = vrsqrt.f32 %v361_v18 }
 0x46c   :  { %1703 = vrsqrt.f32 %v360_v19 }
 0x475   :  { %v1702_v20 = vpop.eup %1701 }
 0x476   :  { %v1704_v22 = vpop.eup %1703  ;;  %v365_v23 = vmul.f32 %v1702_v20, %v349_v2 }
 0x477   :  { %v364_v25 = vmul.f32 %v1704_v22, %v348_v3 }
 0x478   :  { %v373_v26 = vmul.f32 %v1448_v21, %v365_v23 }
 0x479   :  { %v372_v27 = vmul.f32 %v1448_v21, %v364_v25 }
 0x47a   :  { %v381_v28 = vadd.f32 %v1449_v24, %v373_v26 }
 0x47b   :  { %v380_v29 = vadd.f32 %v1449_v24, %v372_v27 }
 0x47c   :  { %v383_v31 = vmax.f32 %v381_v28, 0.0 }
 0x47d   :  { %v382_v30 = vmax.f32 %v380_v29, 0.0 }
 0x47f   :  { %1558 = vmatprep.mubr.msk.f32.mxu0 %vm111_vm0, %v382_v30 }
 0x480   :  { %1559 = vmatmul.mubr.msk.f32.vlgmr.msra.gmra.mrb[2].mxu0 %vm111_vm0, %v383_v31  ;;  %vm512_vm0 = vcmask 522245  }
 0x481   :  { %1658 = vmatpush3.bf16.msra.mxu0 %v2127_v56 }
 0x482   :  { %1662 = vmatprep.subr.bf16.mxu0 %v1893_v55 }
 0x553   :  { %v1560_v33 = vpop.f32.mrb[2].mxu0 }
 0x554   :  { %v473_v34 = vadd.f32 %v1560_v33, %v1450_v32  ;;  %v467_v35 = vpop.f32.mrb[3].mxu0 }
 0x555   :  { %v468_v36 = vadd.f32 %v1450_v32, %v467_v35 }
 0x556   :  { %v478_v37 = vrot.slane %v473_v34, 7 }
 0x557   :  { %524 = vst.msk [vmem:[#allocation2 + $0x7] sm:$0x80] %vm523_vm8, %v468_v36 }
 0x558   :  { %526 = vst.msk [vmem:[#allocation2 + $0xf] sm:$0x1] %vm525_vm2, %v478_v37  ;;  %v480_v38 = vsel %vm479_vm3, %v478_v37, %v468_v36  ;;  %v485_v39 = vsel %vm484_vm4, %v478_v37, %v468_v36  ;;  %v491_v40 = vsel %vm490_vm5, %v478_v37, %v468_v36  ;;  %v497_v41 = vsel %vm496_vm7, %v478_v37, %v468_v36 }
 0x559   :  { %483 = vst.msk [vmem:[#allocation2] sm:$0x3] %vm482_vm6, %v480_v38  ;;  %v503_v42 = vsel %vm502_vm9, %v478_v37, %v468_v36  ;;  %v509_v43 = vsel %vm508_vm10, %v478_v37, %v468_v36  ;;  %v515_v44 = vsel %vm514_vm11, %v478_v37, %v468_v36  ;;  %vm1894_vm2 = vmmov 0  }
 0x55a   :  { %489 = vst.msk [vmem:[#allocation2 + $0x1] sm:$0x6] %vm488_vm12, %v485_v39  ;;  %1565 = vmatprep.mubr.msk.f32.mxu0 %vm1894_vm2, %v1895_v57  ;;  %1572 = vmatprep.mubr.msk.f32.mxu1 %vm1894_vm2, %v1895_v57  ;;  %vm552_vm3 = vcmask 130048  }
 0x55b   :  { %495 = vst.msk [vmem:[#allocation2 + $0x2] sm:$0xc] %vm494_vm13, %v491_v40 }
 0x55c   :  { %501 = vst.msk [vmem:[#allocation2 + $0x3] sm:$0x18] %vm500_vm14, %v497_v41 }
 0x55d   :  { %507 = vst.msk [vmem:[#allocation2 + $0x4] sm:$0x30] %vm506_vm15, %v503_v42 }
 0x55e   :  { %513 = vst.msk [vmem:[#allocation2 + $0x5] sm:$0x60] %vm512_vm0, %v509_v43 }
 0x55f   :  { %519 = vst.msk [vmem:[#allocation2 + $0x6] sm:$0xc0] %vm518_vm1, %v515_v44 }
 0x560   :  { %v529_v45 = vld [vmem:[#allocation2] sm:$0x3] }
 0x561   :  { %1705 = vtanh.f32 %v529_v45  ;;  %v1453_v47 = vmul.f32 -1.442695, %v529_v45  ;;  %v548_v62 = vld [vmem:[#allocation2 + $0x2] sm:$0x3] }
 0x562   :  { %v654_v17 = vld [vmem:[#allocation2 + $0x4] sm:$0x3] }
 0x563   :  { %1707 = vpow2.f32 %v1453_v47  ;;  %v755_v35 = vld [vmem:[#allocation2 + $0x6] sm:$0x3] }
 0x564   :  { %v856_v53 = vld [vmem:[#allocation2 + $0x8] sm:$0x3] }
 0x56b   :  { %v1706_v46 = vpop.eup %1705 }
 0x56c   :  { %538 = vrot.lane.b32.xlu0 %v1706_v46, %s1891_s11 }
 0x56d   :  { %v1708_v48 = vpop.eup %1707 }
 0x56e   :  { %v533_v49 = vadd.f32 1.0, %v1708_v48 }
 0x570   :  { %1709 = vrcp.f32 %v533_v49 }
 0x57a   :  { %v1710_v50 = vpop.eup %1709 }
 0x5de   :  { %v539_v51 = vpop.permute.xlu0 %538 }
 0x5df   :  { %v541_v52 = vmul.f32 %v1710_v50, %v539_v51 }
 0x5e1   :  { %1711 = vtanh.f32 %v541_v52  ;;  %634 = vrot.lane.b32.xlu0 %v541_v52, %s1892_s22 }
 0x5eb   :  { %v1712_v58 = vpop.eup %1711 }
 0x5ec   :  { %544 = vrot.lane.b32.xlu1 %v1712_v58, %s1896_s10 }
 0x653   :  { %v635_v9 = vpop.permute.xlu0 %634 }
 0x65e   :  { %v545_v59 = vpop.permute.xlu1 %544 }
 0x65f   :  { %v547_v60 = vmul.f32 %v1710_v50, %v545_v59 }
 0x661   :  { %550 = vrot.lane.b32.xlu1 %v547_v60, %s1897_s25 }
 0x6d3   :  { %v551_v61 = vpop.permute.xlu1 %550 }
 0x6d4   :  { %1566 = vmatmul.mubr.msk.f32.vlgmr.msra.gmra.mrb[4].mxu0 %vm552_vm3, %v551_v61 }
 0x6d5   :  { %1664 = vmatpush3.bf16.msra.mxu0 %v2127_v56  ;;  %1579 = vmatprep.mubr.msk.f32.mxu0 %vm1894_vm2, %v1895_v57 }
 0x6d6   :  { %1668 = vmatprep.subr.bf16.mxu0 %v1893_v55 }
 0x7a7   :  { %v621_v63 = vpop.f32.mrb[4].mxu0 }
 0x7a8   :  { %v625_v0 = vadd.f32 %v621_v63, %v548_v62  ;;  %v1567_v1 = vpop.f32.mrb[5].mxu0 }
 0x7aa   :  { %1713 = vtanh.f32 %v625_v0  ;;  %v1455_v3 = vmul.f32 -1.442695, %v625_v0 }
 0x7ac   :  { %1715 = vpow2.f32 %v1455_v3 }
 0x7b4   :  { %v1714_v2 = vpop.eup %1713 }
 0x7b5   :  { %639 = vrot.lane.b32.xlu1 %v1714_v2, %s1891_s11 }
 0x7b6   :  { %v1716_v4 = vpop.eup %1715 }
 0x7b7   :  { %v629_v5 = vadd.f32 1.0, %v1716_v4 }
 0x7b9   :  { %1717 = vrcp.f32 %v629_v5 }
 0x7c3   :  { %v1718_v6 = vpop.eup %1717 }
 0x7c4   :  { %v637_v10 = vmul.f32 %v1718_v6, %v635_v9 }
 0x827   :  { %v640_v7 = vpop.permute.xlu1 %639 }
 0x828   :  { %v642_v8 = vmul.f32 %v1718_v6, %v640_v7 }
 0x82a   :  { %644 = vrot.lane.b32.xlu1 %v642_v8, %s1892_s22 }
 0x89c   :  { %v645_v11 = vpop.permute.xlu1 %644 }
 0x89d   :  { %v647_v12 = vadd.f32 %v645_v11, %v637_v10  ;;  %v957_v10 = vld [vmem:[#allocation2 + $0xa] sm:$0x3] }
 0x89f   :  { %1719 = vtanh.f32 %v647_v12 }
 0x8a9   :  { %v1720_v13 = vpop.eup %1719 }
 0x8aa   :  { %650 = vrot.lane.b32.xlu0 %v1720_v13, %s1898_s26 }
 0x91c   :  { %v651_v14 = vpop.permute.xlu0 %650 }
 0x91d   :  { %v653_v15 = vmul.f32 %v1718_v6, %v651_v14 }
 0x91f   :  { %656 = vrot.lane.b32.xlu1 %v653_v15, %s1897_s25 }
 0x991   :  { %v657_v16 = vpop.permute.xlu1 %656 }
 0x992   :  { %1573 = vmatmul.mubr.msk.f32.vlgmr.msra.gmra.mrb[2].mxu1 %vm552_vm3, %v657_v16 }
 0x993   :  { %1667 = vmatpush3.bf16.msra.mxu1 %v2127_v56  ;;  %1586 = vmatprep.mubr.msk.f32.mxu1 %vm1894_vm2, %v1895_v57 }
 0x994   :  { %1671 = vmatprep.subr.bf16.mxu1 %v1893_v55 }
 0xa65   :  { %v726_v18 = vpop.f32.mrb[2].mxu1 }
 0xa66   :  { %v730_v19 = vadd.f32 %v726_v18, %v654_v17  ;;  %v1574_v20 = vpop.f32.mrb[3].mxu1 }
 0xa68   :  { %1721 = vtanh.f32 %v730_v19  ;;  %v1457_v22 = vmul.f32 -1.442695, %v730_v19 }
 0xa6a   :  { %1723 = vpow2.f32 %v1457_v22 }
 0xa72   :  { %v1722_v21 = vpop.eup %1721 }
 0xa73   :  { %740 = vrot.lane.b32.xlu0 %v1722_v21, %s1891_s11 }
 0xa74   :  { %v1724_v23 = vpop.eup %1723 }
 0xa75   :  { %v734_v24 = vadd.f32 1.0, %v1724_v23 }
 0xa77   :  { %1725 = vrcp.f32 %v734_v24 }
 0xa81   :  { %v1726_v25 = vpop.eup %1725 }
 0xa82   :  { %v738_v28 = vmul.f32 %v1726_v25, %v647_v12 }
 0xae5   :  { %v741_v26 = vpop.permute.xlu0 %740 }
 0xae6   :  { %v743_v27 = vmul.f32 %v1726_v25, %v741_v26  ;;  %v1058_v26 = vld [vmem:[#allocation2 + $0xc] sm:$0x3] }
 0xae8   :  { %745 = vrot.lane.b32.xlu1 %v743_v27, %s1892_s22 }
 0xb5a   :  { %v746_v29 = vpop.permute.xlu1 %745 }
 0xb5b   :  { %v748_v30 = vadd.f32 %v746_v29, %v738_v28 }
 0xb5d   :  { %1727 = vtanh.f32 %v748_v30 }
 0xb67   :  { %v1728_v31 = vpop.eup %1727 }
 0xb68   :  { %751 = vrot.lane.b32.xlu0 %v1728_v31, %s1898_s26 }
 0xbda   :  { %v752_v32 = vpop.permute.xlu0 %751 }
 0xbdb   :  { %v754_v33 = vmul.f32 %v1726_v25, %v752_v32 }
 0xbdd   :  { %757 = vrot.lane.b32.xlu1 %v754_v33, %s1897_s25 }
 0xc4f   :  { %v758_v34 = vpop.permute.xlu1 %757 }
 0xc50   :  { %1580 = vmatmul.mubr.msk.f32.vlgmr.msra.gmra.mrb[6].mxu0 %vm552_vm3, %v758_v34 }
 0xc51   :  { %1670 = vmatpush3.bf16.msra.mxu0 %v2127_v56  ;;  %1593 = vmatprep.mubr.msk.f32.mxu0 %vm1894_vm2, %v1895_v57 }
 0xc52   :  { %1674 = vmatprep.subr.bf16.mxu0 %v1893_v55 }
 0xd23   :  { %v827_v36 = vpop.f32.mrb[6].mxu0 }
 0xd24   :  { %v831_v37 = vadd.f32 %v827_v36, %v755_v35  ;;  %v1581_v38 = vpop.f32.mrb[7].mxu0 }
 0xd26   :  { %1729 = vtanh.f32 %v831_v37  ;;  %v1459_v40 = vmul.f32 -1.442695, %v831_v37 }
 0xd28   :  { %1731 = vpow2.f32 %v1459_v40 }
 0xd30   :  { %v1730_v39 = vpop.eup %1729 }
 0xd31   :  { %841 = vrot.lane.b32.xlu0 %v1730_v39, %s1891_s11 }
 0xd32   :  { %v1732_v41 = vpop.eup %1731 }
 0xd33   :  { %v835_v42 = vadd.f32 1.0, %v1732_v41 }
 0xd35   :  { %1733 = vrcp.f32 %v835_v42 }
 0xd3f   :  { %v1734_v43 = vpop.eup %1733 }
 0xd40   :  { %v839_v46 = vmul.f32 %v1734_v43, %v748_v30 }
 0xda3   :  { %v842_v44 = vpop.permute.xlu0 %841 }
 0xda4   :  { %v844_v45 = vmul.f32 %v1734_v43, %v842_v44  ;;  %v1159_v44 = vld [vmem:[#allocation2 + $0xe] sm:$0x3] }
 0xda6   :  { %846 = vrot.lane.b32.xlu1 %v844_v45, %s1892_s22 }
 0xe18   :  { %v847_v47 = vpop.permute.xlu1 %846 }
 0xe19   :  { %v849_v48 = vadd.f32 %v847_v47, %v839_v46 }
 0xe1b   :  { %1735 = vtanh.f32 %v849_v48 }
 0xe25   :  { %v1736_v49 = vpop.eup %1735 }
 0xe26   :  { %852 = vrot.lane.b32.xlu0 %v1736_v49, %s1898_s26 }
 0xe98   :  { %v853_v50 = vpop.permute.xlu0 %852 }
 0xe99   :  { %v855_v51 = vmul.f32 %v1734_v43, %v853_v50 }
 0xe9b   :  { %858 = vrot.lane.b32.xlu1 %v855_v51, %s1897_s25 }
 0xf0d   :  { %v859_v52 = vpop.permute.xlu1 %858 }
 0xf0e   :  { %1587 = vmatmul.mubr.msk.f32.vlgmr.msra.gmra.mrb[4].mxu1 %vm552_vm3, %v859_v52 }
 0xf0f   :  { %1673 = vmatpush3.bf16.msra.mxu1 %v2127_v56  ;;  %1600 = vmatprep.mubr.msk.f32.mxu1 %vm1894_vm2, %v1895_v57 }
 0xf10   :  { %1677 = vmatprep.subr.bf16.mxu1 %v1893_v55 }
 0xfe1   :  { %v928_v54 = vpop.f32.mrb[4].mxu1 }
 0xfe2   :  { %v932_v58 = vadd.f32 %v928_v54, %v856_v53  ;;  %v1588_v59 = vpop.f32.mrb[5].mxu1 }
 0xfe4   :  { %1737 = vtanh.f32 %v932_v58  ;;  %v1461_v61 = vmul.f32 -1.442695, %v932_v58  ;;  %v1263_v58 = vld [vmem:[%s2240_s13 + $0x8] sm:$0xff] }
 0xfe6   :  { %1739 = vpow2.f32 %v1461_v61 }
 0xfee   :  { %v1738_v60 = vpop.eup %1737 }
 0xfef   :  { %942 = vrot.lane.b32.xlu0 %v1738_v60, %s1891_s11 }
 0xff0   :  { %v1740_v62 = vpop.eup %1739 }
 0xff1   :  { %v936_v63 = vadd.f32 1.0, %v1740_v62 }
 0xff3   :  { %1741 = vrcp.f32 %v936_v63  ;;  %v1260_v63 = vld [vmem:[%s2239_s12] sm:$0xff] }
 0xffd   :  { %v1742_v0 = vpop.eup %1741 }
 0xffe   :  { %v940_v3 = vmul.f32 %v1742_v0, %v849_v48 }
0x1061   :  { %v943_v1 = vpop.permute.xlu0 %942 }
0x1062   :  { %v945_v2 = vmul.f32 %v1742_v0, %v943_v1 }
0x1064   :  { %947 = vrot.lane.b32.xlu1 %v945_v2, %s1892_s22 }
0x10d6   :  { %v948_v4 = vpop.permute.xlu1 %947 }
0x10d7   :  { %v950_v5 = vadd.f32 %v948_v4, %v940_v3 }
0x10d9   :  { %1743 = vtanh.f32 %v950_v5 }
0x10e3   :  { %v1744_v6 = vpop.eup %1743 }
0x10e4   :  { %953 = vrot.lane.b32.xlu0 %v1744_v6, %s1898_s26 }
0x1156   :  { %v954_v7 = vpop.permute.xlu0 %953 }
0x1157   :  { %v956_v8 = vmul.f32 %v1742_v0, %v954_v7  ;;  %v1261_v0 = vld [vmem:[%s2239_s12 + $0x8] sm:$0xff] }
0x1158   :  { %v1681_v1 = vpack.c.bf16 %v1261_v0, %v1260_v63 }
0x1159   :  { %959 = vrot.lane.b32.xlu1 %v956_v8, %s1897_s25 }
0x11cb   :  { %v960_v9 = vpop.permute.xlu1 %959 }
0x11cc   :  { %1594 = vmatmul.mubr.msk.f32.vlgmr.msra.gmra.mrb[8].mxu0 %vm552_vm3, %v960_v9 }
0x11cd   :  { %1676 = vmatpush3.bf16.msra.mxu0 %v2127_v56  ;;  %1607 = vmatprep.mubr.msk.f32.mxu0 %vm1894_vm2, %v1895_v57 }
0x11ce   :  { %1680 = vmatprep.subr.bf16.mxu0 %v1893_v55 }
0x129f   :  { %v1029_v11 = vpop.f32.mrb[8].mxu0 }
0x12a0   :  { %v1033_v12 = vadd.f32 %v1029_v11, %v957_v10  ;;  %v1595_v13 = vpop.f32.mrb[9].mxu0  ;;  %v1470_v10 = vld [vmem:[%s2241_s14] ss:$0 sm:$0xff] }
0x12a2   :  { %1745 = vtanh.f32 %v1033_v12  ;;  %v1463_v15 = vmul.f32 -1.442695, %v1033_v12 }
0x12a4   :  { %1747 = vpow2.f32 %v1463_v15 }
0x12ac   :  { %v1746_v14 = vpop.eup %1745 }
0x12ad   :  { %1043 = vrot.lane.b32.xlu0 %v1746_v14, %s1891_s11 }
0x12ae   :  { %v1748_v16 = vpop.eup %1747 }
0x12af   :  { %v1037_v17 = vadd.f32 1.0, %v1748_v16 }
0x12b1   :  { %1749 = vrcp.f32 %v1037_v17 }
0x12bb   :  { %v1750_v18 = vpop.eup %1749 }
0x12bc   :  { %v1041_v20 = vmul.f32 %v1750_v18, %v950_v5 }
0x131f   :  { %v1044_v56 = vpop.permute.xlu0 %1043 }
0x1320   :  { %v1046_v19 = vmul.f32 %v1750_v18, %v1044_v56 }
0x1322   :  { %1048 = vrot.lane.b32.xlu1 %v1046_v19, %s1892_s22 }
0x1394   :  { %v1049_v55 = vpop.permute.xlu1 %1048 }
0x1395   :  { %v1051_v21 = vadd.f32 %v1049_v55, %v1041_v20 }
0x1397   :  { %1751 = vtanh.f32 %v1051_v21 }
0x13a1   :  { %v1752_v22 = vpop.eup %1751 }
0x13a2   :  { %1054 = vrot.lane.b32.xlu0 %v1752_v22, %s1898_s26 }
0x1414   :  { %v1055_v23 = vpop.permute.xlu0 %1054 }
0x1415   :  { %v1057_v24 = vmul.f32 %v1750_v18, %v1055_v23 }
0x1417   :  { %1060 = vrot.lane.b32.xlu1 %v1057_v24, %s1897_s25 }
0x1489   :  { %v1061_v25 = vpop.permute.xlu1 %1060 }
0x148a   :  { %1601 = vmatmul.mubr.msk.f32.vlgmr.msra.gmra.mrb[6].mxu1 %vm552_vm3, %v1061_v25 }
0x148b   :  { %1614 = vmatprep.mubr.msk.f32.mxu1 %vm1894_vm2, %v1895_v57 }
0x155d   :  { %v1130_v27 = vpop.f32.mrb[6].mxu1 }
0x155e   :  { %v1134_v28 = vadd.f32 %v1130_v27, %v1058_v26  ;;  %v1602_v29 = vpop.f32.mrb[7].mxu1 }
0x1560   :  { %1753 = vtanh.f32 %v1134_v28  ;;  %v1465_v31 = vmul.f32 -1.442695, %v1134_v28 }
0x1562   :  { %1755 = vpow2.f32 %v1465_v31 }
0x156a   :  { %v1754_v30 = vpop.eup %1753 }
0x156b   :  { %1144 = vrot.lane.b32.xlu0 %v1754_v30, %s1891_s11 }
0x156c   :  { %v1756_v32 = vpop.eup %1755 }
0x156d   :  { %v1138_v33 = vadd.f32 1.0, %v1756_v32 }
0x156f   :  { %1757 = vrcp.f32 %v1138_v33 }
0x1579   :  { %v1758_v34 = vpop.eup %1757 }
0x157a   :  { %v1142_v37 = vmul.f32 %v1758_v34, %v1051_v21 }
0x15dd   :  { %v1145_v35 = vpop.permute.xlu0 %1144 }
0x15de   :  { %v1147_v36 = vmul.f32 %v1758_v34, %v1145_v35 }
0x15e0   :  { %1149 = vrot.lane.b32.xlu1 %v1147_v36, %s1892_s22 }
0x1652   :  { %v1150_v38 = vpop.permute.xlu1 %1149 }
0x1653   :  { %v1152_v39 = vadd.f32 %v1150_v38, %v1142_v37 }
0x1655   :  { %1759 = vtanh.f32 %v1152_v39 }
0x165f   :  { %v1760_v40 = vpop.eup %1759 }
0x1660   :  { %1155 = vrot.lane.b32.xlu0 %v1760_v40, %s1898_s26 }
0x16d2   :  { %v1156_v41 = vpop.permute.xlu0 %1155 }
0x16d3   :  { %v1158_v42 = vmul.f32 %v1758_v34, %v1156_v41 }
0x16d5   :  { %1161 = vrot.lane.b32.xlu1 %v1158_v42, %s1897_s25 }
0x1747   :  { %v1162_v43 = vpop.permute.xlu1 %1161 }
0x1748   :  { %1608 = vmatmul.mubr.msk.f32.vlgmr.msra.gmra.mrb[10].mxu0 %vm552_vm3, %v1162_v43 }
0x1749   :  { %1621 = vmatprep.mubr.msk.f32.mxu0 %vm1894_vm2, %v1895_v57  ;;  %v1262_v57 = vld [vmem:[%s2240_s13] sm:$0xff]  ;;  %1682 = vmatpush3.bf16.msra.mxu0 %v1681_v1 }
0x174a   :  { %v1678_v59 = vpack.c.bf16 %v1263_v58, %v1262_v57 }
0x174c   :  { %1679 = vmatpush3.bf16.msra.mxu1 %v1678_v59 }
0x181b   :  { %v1231_v45 = vpop.f32.mrb[10].mxu0 }
0x181c   :  { %v1235_v46 = vadd.f32 %v1231_v45, %v1159_v44  ;;  %v1609_v47 = vpop.f32.mrb[11].mxu0 }
0x181e   :  { %1761 = vtanh.f32 %v1235_v46  ;;  %v1467_v49 = vmul.f32 -1.442695, %v1235_v46 }
0x1820   :  { %1763 = vpow2.f32 %v1467_v49 }
0x1828   :  { %v1762_v48 = vpop.eup %1761 }
0x1829   :  { %1245 = vrot.lane.b32.xlu0 %v1762_v48, %s1891_s11 }
0x182a   :  { %v1764_v50 = vpop.eup %1763 }
0x182b   :  { %v1239_v51 = vadd.f32 1.0, %v1764_v50 }
0x182d   :  { %1765 = vrcp.f32 %v1239_v51 }
0x1837   :  { %v1766_v52 = vpop.eup %1765 }
0x1838   :  { %v1243_v60 = vmul.f32 %v1766_v52, %v1152_v39 }
0x189b   :  { %v1246_v53 = vpop.permute.xlu0 %1245 }
0x189c   :  { %v1248_v54 = vmul.f32 %v1766_v52, %v1246_v53 }
0x189e   :  { %1250 = vrot.lane.b32.xlu1 %v1248_v54, %s1892_s22 }
0x1910   :  { %v1251_v61 = vpop.permute.xlu1 %1250 }
0x1911   :  { %v1253_v62 = vadd.f32 %v1251_v61, %v1243_v60 }
0x1913   :  { %1767 = vtanh.f32 %v1253_v62  ;;  %1265 = vrot.lane.b32.xlu1 %v1253_v62, %s1899_s8 }
0x191d   :  { %v1768_v2 = vpop.eup %1767 }
0x191e   :  { %1256 = vrot.lane.b32.xlu0 %v1768_v2, %s1898_s26 }
0x1985   :  { %v1266_v3 = vpop.permute.xlu1 %1265 }
0x1986   :  { %1615 = vmatmul.mubr.msk.f32.vlgmr.msra.gmra.mrb[8].mxu1 %vm552_vm3, %v1266_v3 }
0x1990   :  { %v1257_v4 = vpop.permute.xlu0 %1256 }
0x1991   :  { %v1259_v5 = vmul.f32 %v1766_v52, %v1257_v4 }
0x1993   :  { %1340 = vrot.lane.b32.xlu0 %v1259_v5, %s1897_s25 }
0x1a05   :  { %v1341_v6 = vpop.permute.xlu0 %1340 }
0x1a06   :  { %1622 = vmatmul.mubr.msk.f32.vlgmr.msra.gmra.mrb[12].mxu0 %vm552_vm3, %v1341_v6 }
0x1a59   :  { %v1335_v7 = vpop.f32.mrb[8].mxu1 }
0x1a5a   :  { %v1616_v8 = vpop.f32.mrb[9].mxu1 }
0x1ad9   :  { %v1410_v9 = vpop.f32.mrb[12].mxu0 }
0x1ada   :  { %v1411_v11 = vadd.f32 %v1410_v9, %v1335_v7  ;;  %v1623_v12 = vpop.f32.mrb[13].mxu0 }
0x1adc   :  { %v1421_v13 = vadd.f32 %v1470_v10, %v1411_v11 }
0x1ade   :  { %1422 = vst [vmem:[#allocation11] sm:$0x3] %v1421_v13 }
0x1adf   :  { %1868 = shalt.err (!%p1865_p8)
}
0x1ae0   :  { %s1869_s0 = scalar_lea.hbm %s2242_s15, 32 }
0x1ae1   :  { %p1870_p9 = scmp.ne.s32.totalorder %s2242_s15, %s1869_s0  ;;  %p1873_p10 = scmp.lt.u32.totalorder %s1869_s0, %s2242_s15 }
0x1ae3   :  { %p1875_p11 = pnand %p1873_p10, %p1870_p9 }
0x1ae5   :  { %1878 = shalt.err (!%p1875_p11)
}
0x1ae6   :  { %1432 = dma.vmem_to_hbm [thread:$0]  %s1430_s29, 32, %s2242_s15, [#allocation5]  }
0x1ae7   :  { %1885 = dma.done.wait [#allocation5], 32  }
0x1ae8   :  { %1886 = vsyncadd [#allocation5], 4294967264 }
0x1ae9   :  { %1436 = vsyncpa [#allocation4], 1 }
0x1aea   :  { %1437 = vsyncpa [#allocation7], 1 }
0x1aeb   :  { %1438 = vsyncpa [#allocation10], 1 }
0x1aec   :  { %1439 = vsyncpa [#allocation5], 1 }

</bundles_post_ra>
